<compile_context>
chip_gen: v6e
topology: v6e:2x2x1
jax: 0.10.0
libtpu: 0.0.40
codegen_flags: <defaults>
</compile_context>

<pallas_src>
import functools
import math

import jax
import jax.numpy as jnp
from jax.experimental import pallas as pl
from jax.experimental.pallas import tpu as pltpu


def _pad_axis(a, axis, mult):
    pad = (-a.shape[axis]) % mult
    if pad == 0:
        return a
    widths = [(0, 0)] * a.ndim
    widths[axis] = (0, pad)
    return jnp.pad(a, widths)


def _tile_m(m):
    # Single full block for small M (exact fit, no masking); 256-row tiles
    # otherwise so the grid pipelines DMAs and shards across TCs on v7x.
    return m if m <= 512 else 256


# ---------------------------------------------------------------------------
# Pallas kernels
# ---------------------------------------------------------------------------
def _linear_kernel(x_ref, w_ref, b_ref, o_ref, *, relu):
    # bf16 operands -> f32 MXU accumulation; bias + ReLU in f32; f32 store.
    y = jnp.dot(x_ref[...], w_ref[...], preferred_element_type=jnp.float32)
    y = y + b_ref[...]                       # (1, Np) broadcasts over rows
    if relu:
        y = jnp.maximum(y, 0.0)
    o_ref[...] = y.astype(o_ref.dtype)


def _mlp_head_kernel(x_ref, wfc_ref, bfc_ref, wh_ref, bh_ref, o_ref):
    # Fused tail: out = relu(x @ Wfc + bfc) @ Whead + bhead.
    h = jnp.dot(x_ref[...], wfc_ref[...], preferred_element_type=jnp.float32)
    h = jnp.maximum(h + bfc_ref[...], 0.0)
    y = jnp.dot(h.astype(wh_ref.dtype), wh_ref[...],
                preferred_element_type=jnp.float32)
    o_ref[...] = (y + bh_ref[...]).astype(o_ref.dtype)


# ---------------------------------------------------------------------------
# Pallas wrappers
# ---------------------------------------------------------------------------
def linear_pallas(x, w, b, *, relu):
    """x:(M,K) bf16, w:(K,Np) bf16, b:(1,Np) f32; K, Np multiples of 128."""
    m, k = x.shape
    k2, np_ = w.shape
    assert k == k2 and k % 128 == 0 and np_ % 128 == 0
    tm = _tile_m(m)
    return pl.pallas_call(
        functools.partial(_linear_kernel, relu=relu),
        out_shape=jax.ShapeDtypeStruct((m, np_), jnp.float32),
        grid=(pl.cdiv(m, tm),),
        in_specs=[
            pl.BlockSpec((tm, k), lambda i: (i, 0)),
            pl.BlockSpec((k, np_), lambda i: (0, 0)),   # weight stays resident
            pl.BlockSpec((1, np_), lambda i: (0, 0)),   # bias stays resident
        ],
        out_specs=pl.BlockSpec((tm, np_), lambda i: (i, 0)),
        compiler_params=pltpu.CompilerParams(
            dimension_semantics=("parallel",)),
    )(x, w, b)


def mlp_head_pallas(x, wfc, bfc, wh, bh):
    """Fused fc+head. x:(M,K) bf16; wfc:(K,H) bf16; bfc:(1,H) f32;
    wh:(H,Np) bf16; bh:(1,Np) f32. K, H, Np multiples of 128."""
    m, k = x.shape
    k2, hdim = wfc.shape
    h2, np_ = wh.shape
    assert k == k2 and hdim == h2
    assert k % 128 == 0 and hdim % 128 == 0 and np_ % 128 == 0
    tm = _tile_m(m)
    return pl.pallas_call(
        _mlp_head_kernel,
        out_shape=jax.ShapeDtypeStruct((m, np_), jnp.float32),
        grid=(pl.cdiv(m, tm),),
        in_specs=[
            pl.BlockSpec((tm, k), lambda i: (i, 0)),
            pl.BlockSpec((k, hdim), lambda i: (0, 0)),
            pl.BlockSpec((1, hdim), lambda i: (0, 0)),
            pl.BlockSpec((hdim, np_), lambda i: (0, 0)),
            pl.BlockSpec((1, np_), lambda i: (0, 0)),
        ],
        out_specs=pl.BlockSpec((tm, np_), lambda i: (i, 0)),
        compiler_params=pltpu.CompilerParams(
            dimension_semantics=("parallel",)),
    )(x, wfc, bfc, wh, bh)


# ---------------------------------------------------------------------------
# Conv lowering glue (NHWC: channel stays in the lane dim, no minor transpose)
# ---------------------------------------------------------------------------
def _extract_patches_nhwc(x, kh, kw, stride):
    """x:(N,H,W,C) -> patches (N*Ho*Wo, kh*kw*C), plus (Ho, Wo)."""
    n, h, w, c = x.shape
    ho = (h - kh) // stride + 1
    wo = (w - kw) // stride + 1
    taps = [x[:, i:i + stride * ho:stride, j:j + stride * wo:stride, :]
            for i in range(kh) for j in range(kw)]
    cols = jnp.stack(taps, axis=3)                 # (N, Ho, Wo, kh*kw, C)
    return cols.reshape(n * ho * wo, kh * kw * c), ho, wo
    # TODO(synk): fold the kh*kw taps into the kernel as a reduction grid axis
    # to avoid the kh*kw read amplification on very large inputs.


def conv2d_relu_pallas(x_nhwc, weight, bias, stride):
    """NHWC conv (VALID) + ReLU. weight:(outC,inC,kh,kw), bias:(outC,)."""
    out_c, in_c, kh, kw = weight.shape
    n = x_nhwc.shape[0]
    patches, ho, wo = _extract_patches_nhwc(x_nhwc, kh, kw, stride)
    patches = _pad_axis(patches, 1, 128).astype(jnp.bfloat16)
    # (kh,kw,inC) feature ordering to match the NHWC patch columns.
    w2d = jnp.transpose(weight, (2, 3, 1, 0)).reshape(kh * kw * in_c, out_c)
    w2d = _pad_axis(_pad_axis(w2d, 0, 128), 1, 128).astype(jnp.bfloat16)
    b2d = _pad_axis(bias.reshape(1, out_c).astype(jnp.float32), 1, 128)
    y = linear_pallas(patches, w2d, b2d, relu=True)       # (M, Np) f32
    return y[:, :out_c].reshape(n, ho, wo, out_c)


# ---------------------------------------------------------------------------
# Deterministic parameter initialization (PyTorch-style uniform bounds)
# ---------------------------------------------------------------------------
def _init_conv(key, out_c, in_c, kh, kw):
    fan_in = in_c * kh * kw
    bound = 1.0 / math.sqrt(fan_in)
    k1, k2 = jax.random.split(key)
    w = jax.random.uniform(k1, (out_c, in_c, kh, kw), jnp.float32, -bound, bound)
    b = jax.random.uniform(k2, (out_c,), jnp.float32, -bound, bound)
    return w, b


def _init_fc(key, fan_in, fan_out):
    bound = 1.0 / math.sqrt(fan_in)
    k1, k2 = jax.random.split(key)
    w = jax.random.uniform(k1, (fan_in, fan_out), jnp.float32, -bound, bound)
    b = jax.random.uniform(k2, (1, fan_out), jnp.float32, -bound, bound)
    return w, b


def conv2d_size_out(size, kernel_size, stride):
    return (size - (kernel_size - 1) - 1) // stride + 1


def make_dqn_params(key, h, w, outputs):
    keys = jax.random.split(key, 5)
    convw = conv2d_size_out(conv2d_size_out(conv2d_size_out(w, 8, 4), 4, 2), 3, 1)
    convh = conv2d_size_out(conv2d_size_out(conv2d_size_out(h, 8, 4), 4, 2), 3, 1)
    linear_input_size = convw * convh * 64
    return {
        "conv1": _init_conv(keys[0], 32, 1, 8, 8),
        "conv2": _init_conv(keys[1], 64, 32, 4, 4),
        "conv3": _init_conv(keys[2], 64, 64, 3, 3),
        "fc": _init_fc(keys[3], linear_input_size, 512),
        "head": _init_fc(keys[4], 512, outputs),
    }


# ---------------------------------------------------------------------------
# Forward pass
# ---------------------------------------------------------------------------
def dqn_forward(params, x_nchw):
    """x:(N,1,H,W) f32 (NCHW, PyTorch convention) -> (N, outputs) f32."""
    x = jnp.transpose(x_nchw, (0, 2, 3, 1))               # NCHW -> NHWC once
    x = conv2d_relu_pallas(x, *params["conv1"], stride=4)
    x = conv2d_relu_pallas(x, *params["conv2"], stride=2)
    x = conv2d_relu_pallas(x, *params["conv3"], stride=1)
    n = x.shape[0]
    # PyTorch's x.view(N,-1) flattens in (C,H,W) order; conv3 output is tiny.
    x = jnp.transpose(x, (0, 3, 1, 2)).reshape(n, -1)

    wfc, bfc = params["fc"]
    wh, bh = params["head"]
    outputs = wh.shape[1]
    x = _pad_axis(x, 1, 128).astype(jnp.bfloat16)
    wfc_p = _pad_axis(wfc, 0, 128).astype(jnp.bfloat16)
    wh_p = _pad_axis(wh, 1, 128).astype(jnp.bfloat16)
    bh_p = _pad_axis(bh, 1, 128)
    y = mlp_head_pallas(x, wfc_p, bfc, wh_p, bh_p)
    return y[:, :outputs]


# ---------------------------------------------------------------------------
# Pure-JAX f32 reference (NCHW) for a sanity check
# ---------------------------------------------------------------------------
def _conv_ref(x, weight, bias, stride):
    y = jax.lax.conv_general_dilated(
        x, weight, (stride, stride), "VALID",
        dimension_numbers=("NCHW", "OIHW", "NCHW"))
    return jnp.maximum(y + bias.reshape(1, -1, 1, 1), 0.0)


def dqn_forward_ref(params, x):
    x = _conv_ref(x, *params["conv1"], stride=4)
    x = _conv_ref(x, *params["conv2"], stride=2)
    x = _conv_ref(x, *params["conv3"], stride=1)
    x = x.reshape(x.shape[0], -1)
    x = jnp.maximum(x @ params["fc"][0] + params["fc"][1], 0.0)
    return x @ params["head"][0] + params["head"][1]


if __name__ == "__main__":
    key = jax.random.PRNGKey(0)
    k_param, k_x = jax.random.split(key)

    H = W = 64          # conv stack output 4x4x64 = 1024 features
    OUTPUTS = 4         # number of actions
    BATCH = 2

    params = make_dqn_params(k_param, H, W, OUTPUTS)
    x = jax.random.normal(k_x, (BATCH, 1, H, W), dtype=jnp.float32)

    fwd = jax.jit(dqn_forward)
    out = jax.block_until_ready(fwd(params, x))
    assert out.shape == (BATCH, OUTPUTS), out.shape

    ref = jax.block_until_ready(dqn_forward_ref(params, x))
    assert jnp.all(jnp.isfinite(out))
    # bf16 operands / f32 accumulation vs. all-f32 reference.
    assert jnp.allclose(out, ref, rtol=2e-2, atol=2e-2), (out, ref)

    print("KERNEL_OK")
</pallas_src>

<mosaic_0001>
module attributes {stable_mosaic.version = 11 : i64} {
  func.func @_linear_kernel(%arg0: i32, %arg1: memref<450x128xbf16, #tpu.memory_space<vmem>>, %arg2: memref<128x128xbf16, #tpu.memory_space<vmem>>, %arg3: memref<1x128xf32, #tpu.memory_space<vmem>>, %arg4: memref<450x128xf32, #tpu.memory_space<vmem>>) attributes {dimension_semantics = [#tpu.dimension_semantics<parallel>], iteration_bounds = array<i64: 1>, scalar_prefetch = 0 : i64, scratch_operands = 0 : i64, tpu.core_type = #tpu.core_type<tc>, window_params = [{transform_indices = @transform_0, window_bounds = array<i64: 450, 128>}, {pipeline_mode = #tpu.pipeline_mode<synchronous>, transform_indices = @transform_1, window_bounds = array<i64: 128, 128>}, {pipeline_mode = #tpu.pipeline_mode<synchronous>, transform_indices = @transform_2, window_bounds = array<i64: 1, 128>}, {transform_indices = @transform_3, window_bounds = array<i64: 450, 128>}]} {
    %c0 = arith.constant 0 : index
    %c0_0 = arith.constant 0 : index
    %0 = vector.load %arg1[%c0, %c0_0] : memref<450x128xbf16, #tpu.memory_space<vmem>>, vector<450x128xbf16>
    %c0_1 = arith.constant 0 : index
    %c0_2 = arith.constant 0 : index
    %1 = vector.load %arg2[%c0_1, %c0_2] : memref<128x128xbf16, #tpu.memory_space<vmem>>, vector<128x128xbf16>
    %cst = arith.constant dense<0.000000e+00> : vector<450x128xf32>
    %2 = tpu.matmul %0, %1, %cst {dimension_numbers = #tpu.dot_dimension_numbers<[1], [0], [0], [1], [0, 0, 1, 1], [], []>} : vector<450x128xbf16>, vector<128x128xbf16>, vector<450x128xf32> -> vector<450x128xf32>
    %c0_3 = arith.constant 0 : index
    %c0_4 = arith.constant 0 : index
    %3 = vector.load %arg3[%c0_3, %c0_4] : memref<1x128xf32, #tpu.memory_space<vmem>>, vector<1x128xf32>
    %4 = vector.broadcast %3 : vector<1x128xf32> to vector<450x128xf32>
    %5 = arith.addf %2, %4 : vector<450x128xf32>
    %cst_5 = arith.constant 0.000000e+00 : f32
    %6 = vector.broadcast %cst_5 : f32 to vector<450x128xf32>
    %7 = arith.maximumf %5, %6 : vector<450x128xf32>
    %c0_6 = arith.constant 0 : index
    %c0_7 = arith.constant 0 : index
    %8 = vector.load %arg4[%c0_6, %c0_7] : memref<450x128xf32, #tpu.memory_space<vmem>>, vector<450x128xf32>
    tpu.vector_store %arg4[%c0_6, %c0_7], %7 {strides = array<i32>} : memref<450x128xf32, #tpu.memory_space<vmem>>, vector<450x128xf32>,
    return
  }
  func.func @transform_0(%arg0: i32) -> (i32, i32) {
    %c0_i32 = arith.constant 0 : i32
    %c0_i32_0 = arith.constant 0 : i32
    return %arg0, %c0_i32 : i32, i32
  }
  func.func @transform_1(%arg0: i32) -> (i32, i32) {
    %c0_i32 = arith.constant 0 : i32
    %c0_i32_0 = arith.constant 0 : i32
    %c0_i32_1 = arith.constant 0 : i32
    return %c0_i32, %c0_i32_0 : i32, i32
  }
  func.func @transform_2(%arg0: i32) -> (i32, i32) {
    %c0_i32 = arith.constant 0 : i32
    %c0_i32_0 = arith.constant 0 : i32
    %c0_i32_1 = arith.constant 0 : i32
    return %c0_i32, %c0_i32_0 : i32, i32
  }
  func.func @transform_3(%arg0: i32) -> (i32, i32) {
    %c0_i32 = arith.constant 0 : i32
    %c0_i32_0 = arith.constant 0 : i32
    return %arg0, %c0_i32 : i32, i32
  }
}

module attributes {stable_mosaic.version = 11 : i64} {
  func.func @_linear_kernel(%arg0: i32, %arg1: memref<72x512xbf16, #tpu.memory_space<vmem>>, %arg2: memref<512x128xbf16, #tpu.memory_space<vmem>>, %arg3: memref<1x128xf32, #tpu.memory_space<vmem>>, %arg4: memref<72x128xf32, #tpu.memory_space<vmem>>) attributes {dimension_semantics = [#tpu.dimension_semantics<parallel>], iteration_bounds = array<i64: 1>, scalar_prefetch = 0 : i64, scratch_operands = 0 : i64, tpu.core_type = #tpu.core_type<tc>, window_params = [{transform_indices = @transform_0, window_bounds = array<i64: 72, 512>}, {pipeline_mode = #tpu.pipeline_mode<synchronous>, transform_indices = @transform_1, window_bounds = array<i64: 512, 128>}, {pipeline_mode = #tpu.pipeline_mode<synchronous>, transform_indices = @transform_2, window_bounds = array<i64: 1, 128>}, {transform_indices = @transform_3, window_bounds = array<i64: 72, 128>}]} {
    %c0 = arith.constant 0 : index
    %c0_0 = arith.constant 0 : index
    %0 = vector.load %arg1[%c0, %c0_0] : memref<72x512xbf16, #tpu.memory_space<vmem>>, vector<72x512xbf16>
    %c0_1 = arith.constant 0 : index
    %c0_2 = arith.constant 0 : index
    %1 = vector.load %arg2[%c0_1, %c0_2] : memref<512x128xbf16, #tpu.memory_space<vmem>>, vector<512x128xbf16>
    %cst = arith.constant dense<0.000000e+00> : vector<72x128xf32>
    %2 = tpu.matmul %0, %1, %cst {dimension_numbers = #tpu.dot_dimension_numbers<[1], [0], [0], [1], [0, 0, 1, 1], [], []>} : vector<72x512xbf16>, vector<512x128xbf16>, vector<72x128xf32> -> vector<72x128xf32>
    %c0_3 = arith.constant 0 : index
    %c0_4 = arith.constant 0 : index
    %3 = vector.load %arg3[%c0_3, %c0_4] : memref<1x128xf32, #tpu.memory_space<vmem>>, vector<1x128xf32>
    %4 = vector.broadcast %3 : vector<1x128xf32> to vector<72x128xf32>
    %5 = arith.addf %2, %4 : vector<72x128xf32>
    %cst_5 = arith.constant 0.000000e+00 : f32
    %6 = vector.broadcast %cst_5 : f32 to vector<72x128xf32>
    %7 = arith.maximumf %5, %6 : vector<72x128xf32>
    %c0_6 = arith.constant 0 : index
    %c0_7 = arith.constant 0 : index
    %8 = vector.load %arg4[%c0_6, %c0_7] : memref<72x128xf32, #tpu.memory_space<vmem>>, vector<72x128xf32>
    tpu.vector_store %arg4[%c0_6, %c0_7], %7 {strides = array<i32>} : memref<72x128xf32, #tpu.memory_space<vmem>>, vector<72x128xf32>,
    return
  }
  func.func @transform_0(%arg0: i32) -> (i32, i32) {
    %c0_i32 = arith.constant 0 : i32
    %c0_i32_0 = arith.constant 0 : i32
    return %arg0, %c0_i32 : i32, i32
  }
  func.func @transform_1(%arg0: i32) -> (i32, i32) {
    %c0_i32 = arith.constant 0 : i32
    %c0_i32_0 = arith.constant 0 : i32
    %c0_i32_1 = arith.constant 0 : i32
    return %c0_i32, %c0_i32_0 : i32, i32
  }
  func.func @transform_2(%arg0: i32) -> (i32, i32) {
    %c0_i32 = arith.constant 0 : i32
    %c0_i32_0 = arith.constant 0 : i32
    %c0_i32_1 = arith.constant 0 : i32
    return %c0_i32, %c0_i32_0 : i32, i32
  }
  func.func @transform_3(%arg0: i32) -> (i32, i32) {
    %c0_i32 = arith.constant 0 : i32
    %c0_i32_0 = arith.constant 0 : i32
    return %arg0, %c0_i32 : i32, i32
  }
}

module attributes {stable_mosaic.version = 11 : i64} {
  func.func @_linear_kernel(%arg0: i32, %arg1: memref<32x640xbf16, #tpu.memory_space<vmem>>, %arg2: memref<640x128xbf16, #tpu.memory_space<vmem>>, %arg3: memref<1x128xf32, #tpu.memory_space<vmem>>, %arg4: memref<32x128xf32, #tpu.memory_space<vmem>>) attributes {dimension_semantics = [#tpu.dimension_semantics<parallel>], iteration_bounds = array<i64: 1>, scalar_prefetch = 0 : i64, scratch_operands = 0 : i64, tpu.core_type = #tpu.core_type<tc>, window_params = [{transform_indices = @transform_0, window_bounds = array<i64: 32, 640>}, {pipeline_mode = #tpu.pipeline_mode<synchronous>, transform_indices = @transform_1, window_bounds = array<i64: 640, 128>}, {pipeline_mode = #tpu.pipeline_mode<synchronous>, transform_indices = @transform_2, window_bounds = array<i64: 1, 128>}, {transform_indices = @transform_3, window_bounds = array<i64: 32, 128>}]} {
    %c0 = arith.constant 0 : index
    %c0_0 = arith.constant 0 : index
    %0 = vector.load %arg1[%c0, %c0_0] : memref<32x640xbf16, #tpu.memory_space<vmem>>, vector<32x640xbf16>
    %c0_1 = arith.constant 0 : index
    %c0_2 = arith.constant 0 : index
    %1 = vector.load %arg2[%c0_1, %c0_2] : memref<640x128xbf16, #tpu.memory_space<vmem>>, vector<640x128xbf16>
    %cst = arith.constant dense<0.000000e+00> : vector<32x128xf32>
    %2 = tpu.matmul %0, %1, %cst {dimension_numbers = #tpu.dot_dimension_numbers<[1], [0], [0], [1], [0, 0, 1, 1], [], []>} : vector<32x640xbf16>, vector<640x128xbf16>, vector<32x128xf32> -> vector<32x128xf32>
    %c0_3 = arith.constant 0 : index
    %c0_4 = arith.constant 0 : index
    %3 = vector.load %arg3[%c0_3, %c0_4] : memref<1x128xf32, #tpu.memory_space<vmem>>, vector<1x128xf32>
    %4 = vector.broadcast %3 : vector<1x128xf32> to vector<32x128xf32>
    %5 = arith.addf %2, %4 : vector<32x128xf32>
    %cst_5 = arith.constant 0.000000e+00 : f32
    %6 = vector.broadcast %cst_5 : f32 to vector<32x128xf32>
    %7 = arith.maximumf %5, %6 : vector<32x128xf32>
    %c0_6 = arith.constant 0 : index
    %c0_7 = arith.constant 0 : index
    %8 = vector.load %arg4[%c0_6, %c0_7] : memref<32x128xf32, #tpu.memory_space<vmem>>, vector<32x128xf32>
    tpu.vector_store %arg4[%c0_6, %c0_7], %7 {strides = array<i32>} : memref<32x128xf32, #tpu.memory_space<vmem>>, vector<32x128xf32>,
    return
  }
  func.func @transform_0(%arg0: i32) -> (i32, i32) {
    %c0_i32 = arith.constant 0 : i32
    %c0_i32_0 = arith.constant 0 : i32
    return %arg0, %c0_i32 : i32, i32
  }
  func.func @transform_1(%arg0: i32) -> (i32, i32) {
    %c0_i32 = arith.constant 0 : i32
    %c0_i32_0 = arith.constant 0 : i32
    %c0_i32_1 = arith.constant 0 : i32
    return %c0_i32, %c0_i32_0 : i32, i32
  }
  func.func @transform_2(%arg0: i32) -> (i32, i32) {
    %c0_i32 = arith.constant 0 : i32
    %c0_i32_0 = arith.constant 0 : i32
    %c0_i32_1 = arith.constant 0 : i32
    return %c0_i32, %c0_i32_0 : i32, i32
  }
  func.func @transform_3(%arg0: i32) -> (i32, i32) {
    %c0_i32 = arith.constant 0 : i32
    %c0_i32_0 = arith.constant 0 : i32
    return %arg0, %c0_i32 : i32, i32
  }
}

module attributes {stable_mosaic.version = 11 : i64} {
  func.func @_mlp_head_kernel(%arg0: i32, %arg1: memref<2x1024xbf16, #tpu.memory_space<vmem>>, %arg2: memref<1024x512xbf16, #tpu.memory_space<vmem>>, %arg3: memref<1x512xf32, #tpu.memory_space<vmem>>, %arg4: memref<512x128xbf16, #tpu.memory_space<vmem>>, %arg5: memref<1x128xf32, #tpu.memory_space<vmem>>, %arg6: memref<2x128xf32, #tpu.memory_space<vmem>>) attributes {dimension_semantics = [#tpu.dimension_semantics<parallel>], iteration_bounds = array<i64: 1>, scalar_prefetch = 0 : i64, scratch_operands = 0 : i64, tpu.core_type = #tpu.core_type<tc>, window_params = [{transform_indices = @transform_0, window_bounds = array<i64: 2, 1024>}, {pipeline_mode = #tpu.pipeline_mode<synchronous>, transform_indices = @transform_1, window_bounds = array<i64: 1024, 512>}, {pipeline_mode = #tpu.pipeline_mode<synchronous>, transform_indices = @transform_2, window_bounds = array<i64: 1, 512>}, {pipeline_mode = #tpu.pipeline_mode<synchronous>, transform_indices = @transform_3, window_bounds = array<i64: 512, 128>}, {pipeline_mode = #tpu.pipeline_mode<synchronous>, transform_indices = @transform_4, window_bounds = array<i64: 1, 128>}, {transform_indices = @transform_5, window_bounds = array<i64: 2, 128>}]} {
    %c0 = arith.constant 0 : index
    %c0_0 = arith.constant 0 : index
    %0 = vector.load %arg1[%c0, %c0_0] : memref<2x1024xbf16, #tpu.memory_space<vmem>>, vector<2x1024xbf16>
    %c0_1 = arith.constant 0 : index
    %c0_2 = arith.constant 0 : index
    %1 = vector.load %arg2[%c0_1, %c0_2] : memref<1024x512xbf16, #tpu.memory_space<vmem>>, vector<1024x512xbf16>
    %cst = arith.constant dense<0.000000e+00> : vector<2x512xf32>
    %2 = tpu.matmul %0, %1, %cst {dimension_numbers = #tpu.dot_dimension_numbers<[1], [0], [0], [1], [0, 0, 1, 1], [], []>} : vector<2x1024xbf16>, vector<1024x512xbf16>, vector<2x512xf32> -> vector<2x512xf32>
    %c0_3 = arith.constant 0 : index
    %c0_4 = arith.constant 0 : index
    %3 = vector.load %arg3[%c0_3, %c0_4] : memref<1x512xf32, #tpu.memory_space<vmem>>, vector<1x512xf32>
    %4 = vector.broadcast %3 : vector<1x512xf32> to vector<2x512xf32>
    %5 = arith.addf %2, %4 : vector<2x512xf32>
    %cst_5 = arith.constant 0.000000e+00 : f32
    %6 = vector.broadcast %cst_5 : f32 to vector<2x512xf32>
    %7 = arith.maximumf %5, %6 : vector<2x512xf32>
    %8 = arith.truncf %7 : vector<2x512xf32> to vector<2x512xbf16>
    %c0_6 = arith.constant 0 : index
    %c0_7 = arith.constant 0 : index
    %9 = vector.load %arg4[%c0_6, %c0_7] : memref<512x128xbf16, #tpu.memory_space<vmem>>, vector<512x128xbf16>
    %cst_8 = arith.constant dense<0.000000e+00> : vector<2x128xf32>
    %10 = tpu.matmul %8, %9, %cst_8 {dimension_numbers = #tpu.dot_dimension_numbers<[1], [0], [0], [1], [0, 0, 1, 1], [], []>} : vector<2x512xbf16>, vector<512x128xbf16>, vector<2x128xf32> -> vector<2x128xf32>
    %c0_9 = arith.constant 0 : index
    %c0_10 = arith.constant 0 : index
    %11 = vector.load %arg5[%c0_9, %c0_10] : memref<1x128xf32, #tpu.memory_space<vmem>>, vector<1x128xf32>
    %12 = vector.broadcast %11 : vector<1x128xf32> to vector<2x128xf32>
    %13 = arith.addf %10, %12 : vector<2x128xf32>
    %c0_11 = arith.constant 0 : index
    %c0_12 = arith.constant 0 : index
    %14 = vector.load %arg6[%c0_11, %c0_12] : memref<2x128xf32, #tpu.memory_space<vmem>>, vector<2x128xf32>
    tpu.vector_store %arg6[%c0_11, %c0_12], %13 {strides = array<i32>} : memref<2x128xf32, #tpu.memory_space<vmem>>, vector<2x128xf32>,
    return
  }
  func.func @transform_0(%arg0: i32) -> (i32, i32) {
    %c0_i32 = arith.constant 0 : i32
    %c0_i32_0 = arith.constant 0 : i32
    return %arg0, %c0_i32 : i32, i32
  }
  func.func @transform_1(%arg0: i32) -> (i32, i32) {
    %c0_i32 = arith.constant 0 : i32
    %c0_i32_0 = arith.constant 0 : i32
    %c0_i32_1 = arith.constant 0 : i32
    return %c0_i32, %c0_i32_0 : i32, i32
  }
  func.func @transform_2(%arg0: i32) -> (i32, i32) {
    %c0_i32 = arith.constant 0 : i32
    %c0_i32_0 = arith.constant 0 : i32
    %c0_i32_1 = arith.constant 0 : i32
    return %c0_i32, %c0_i32_0 : i32, i32
  }
  func.func @transform_3(%arg0: i32) -> (i32, i32) {
    %c0_i32 = arith.constant 0 : i32
    %c0_i32_0 = arith.constant 0 : i32
    %c0_i32_1 = arith.constant 0 : i32
    return %c0_i32, %c0_i32_0 : i32, i32
  }
  func.func @transform_4(%arg0: i32) -> (i32, i32) {
    %c0_i32 = arith.constant 0 : i32
    %c0_i32_0 = arith.constant 0 : i32
    %c0_i32_1 = arith.constant 0 : i32
    return %c0_i32, %c0_i32_0 : i32, i32
  }
  func.func @transform_5(%arg0: i32) -> (i32, i32) {
    %c0_i32 = arith.constant 0 : i32
    %c0_i32_0 = arith.constant 0 : i32
    return %arg0, %c0_i32 : i32, i32
  }
}

</mosaic_0001>

<bundles_post_ra>
// kernel: dqn_forward.4
= control target key start
LH: loop header
LB: loop body
LE: loop exit
PB: predicated region body
PF: predicated region fallthrough
CT: control target
= control target key end

     0   :  { %v959_v0 = vmov 0.0   ;;  %vm960_vm0 = vmmov 0   ;;  %s1399_s1 = inlined_call_operand.vmem [shape: bf16[128,128], index: 1, kind: input, shape index: {}]   ;;  %s1400_s0 = inlined_call_operand.vmem [shape: bf16[450,128], index: 0, kind: input, shape index: {}]   ;;  %s1401_s2 = inlined_call_operand.vmem [shape: f32[1,128], index: 2, kind: input, shape index: {}]   ;;  %s1402_s3 = inlined_call_operand.vmem [shape: f32[450,128], index: 3, kind: output, shape index: {}]  }
   0x1   :  { %772 = vmatprep.subr.bf16.mxu0 %v959_v0  ;;  %v922_v1 = vld [vmem:[%s1399_s1 + $0x38] sm:$0xff]   ;;  %904 = vmatprep.subr.bf16.mxu1 %v959_v0  ;;  %v923_v2 = vld [vmem:[%s1399_s1 + $0x30] sm:$0xff]   ;;  %v924_v3 = vld [vmem:[%s1399_s1 + $0x28] sm:$0xff]  }
   0x2   :  { %788 = vmatprep.mubr.msk.bf16.mxu0 %vm960_vm0, %v959_v0  ;;  %848 = vmatprep.mubr.msk.bf16.mxu1 %vm960_vm0, %v959_v0  ;;  %v925_v4 = vld [vmem:[%s1399_s1 + $0x20] sm:$0xff]   ;;  %v926_v5 = vld [vmem:[%s1399_s1 + $0x18] sm:$0xff]   ;;  %v927_v6 = vld [vmem:[%s1399_s1 + $0x10] sm:$0xff]  }
   0x3   :  { %773 = vmatpush3.bf16.msra.mxu0 %v922_v1  ;;  %912 = vmatpush3.bf16.msra.mxu1 %v922_v1  ;;  %v928_v7 = vld [vmem:[%s1399_s1 + $0x8] sm:$0xff]   ;;  %v929_v8 = vld [vmem:[%s1399_s1] sm:$0xff]   ;;  %v931_v10 = vld [vmem:[%s1400_s0 + $0x78] sm:$0xff]  }
   0x4   :  { %774 = vmatprep.subr.bf16.mxu0 %v959_v0  ;;  %905 = vmatprep.subr.bf16.mxu1 %v959_v0  ;;  %v930_v9 = vld [vmem:[%s1400_s0] sm:$0xff]   ;;  %v932_v11 = vld [vmem:[%s1400_s0 + $0x8] sm:$0xff]   ;;  %v934_v13 = vld [vmem:[%s1400_s0 + $0x10] sm:$0xff]  }
   0x5   :  { %v933_v12 = vld [vmem:[%s1400_s0 + $0x80] sm:$0xff]   ;;  %v935_v14 = vld [vmem:[%s1400_s0 + $0x88] sm:$0xff]   ;;  %v936_v15 = vld [vmem:[%s1400_s0 + $0x18] sm:$0xff]  }
   0x6   :  { %v937_v16 = vld [vmem:[%s1400_s0 + $0x90] sm:$0xff]   ;;  %v938_v17 = vld [vmem:[%s1400_s0 + $0x20] sm:$0xff]   ;;  %v939_v18 = vld [vmem:[%s1400_s0 + $0x98] sm:$0xff]  }
   0x7   :  { %775 = vmatpush3.bf16.msra.mxu0 %v923_v2  ;;  %913 = vmatpush3.bf16.msra.mxu1 %v923_v2  ;;  %v940_v19 = vld [vmem:[%s1400_s0 + $0x28] sm:$0xff]   ;;  %v941_v20 = vld [vmem:[%s1400_s0 + $0xa0] sm:$0xff]   ;;  %v942_v21 = vld [vmem:[%s1400_s0 + $0x30] sm:$0xff]  }
   0x8   :  { %776 = vmatprep.subr.bf16.mxu0 %v959_v0  ;;  %906 = vmatprep.subr.bf16.mxu1 %v959_v0  ;;  %v943_v22 = vld [vmem:[%s1400_s0 + $0xa8] sm:$0xff]   ;;  %v944_v23 = vld [vmem:[%s1400_s0 + $0x38] sm:$0xff]   ;;  %v945_v24 = vld [vmem:[%s1400_s0 + $0xb0] sm:$0xff]  }
   0x9   :  { %v946_v25 = vld [vmem:[%s1400_s0 + $0x40] sm:$0xff]   ;;  %v947_v26 = vld [vmem:[%s1400_s0 + $0xb8] sm:$0xff]   ;;  %v948_v27 = vld [vmem:[%s1400_s0 + $0x48] sm:$0xff]  }
   0xa   :  { %v949_v28 = vld [vmem:[%s1400_s0 + $0xc0] sm:$0xff]   ;;  %v950_v29 = vld [vmem:[%s1400_s0 + $0x50] sm:$0xff]   ;;  %v951_v30 = vld [vmem:[%s1400_s0 + $0xc8] sm:$0xff]  }
   0xb   :  { %777 = vmatpush3.bf16.msra.mxu0 %v924_v3  ;;  %914 = vmatpush3.bf16.msra.mxu1 %v924_v3  ;;  %v952_v31 = vld [vmem:[%s1400_s0 + $0x58] sm:$0xff]   ;;  %v953_v32 = vld [vmem:[%s1400_s0 + $0xd0] sm:$0xff]   ;;  %v954_v33 = vld [vmem:[%s1400_s0 + $0x60] sm:$0xff]  }
   0xc   :  { %778 = vmatprep.subr.bf16.mxu0 %v959_v0  ;;  %907 = vmatprep.subr.bf16.mxu1 %v959_v0  ;;  %v955_v34 = vld [vmem:[%s1400_s0 + $0xd8] sm:$0xff]   ;;  %v956_v35 = vld [vmem:[%s1400_s0 + $0x68] sm:$0xff]   ;;  %v957_v36 = vld [vmem:[%s1400_s0 + $0xe0] ss:$0 sps:$4 sm:$0x11]  }
   0xd   :  { %v958_v37 = vld [vmem:[%s1400_s0 + $0x70] sm:$0xff]   ;;  %v1169_v38 = vld [vmem:[%s1401_s2] ss:$0 sm:$0xff] }
   0xf   :  { %779 = vmatpush3.bf16.msra.mxu0 %v925_v4  ;;  %915 = vmatpush3.bf16.msra.mxu1 %v925_v4 }
  0x10   :  { %780 = vmatprep.subr.bf16.mxu0 %v959_v0  ;;  %908 = vmatprep.subr.bf16.mxu1 %v959_v0 }
  0x13   :  { %781 = vmatpush3.bf16.msra.mxu0 %v926_v5  ;;  %916 = vmatpush3.bf16.msra.mxu1 %v926_v5 }
  0x14   :  { %782 = vmatprep.subr.bf16.mxu0 %v959_v0  ;;  %909 = vmatprep.subr.bf16.mxu1 %v959_v0 }
  0x17   :  { %783 = vmatpush3.bf16.msra.mxu0 %v927_v6  ;;  %917 = vmatpush3.bf16.msra.mxu1 %v927_v6 }
  0x18   :  { %784 = vmatprep.subr.bf16.mxu0 %v959_v0  ;;  %910 = vmatprep.subr.bf16.mxu1 %v959_v0 }
  0x1b   :  { %785 = vmatpush3.bf16.msra.mxu0 %v928_v7  ;;  %918 = vmatpush3.bf16.msra.mxu1 %v928_v7 }
  0x1c   :  { %786 = vmatprep.subr.bf16.mxu0 %v959_v0  ;;  %911 = vmatprep.subr.bf16.mxu1 %v959_v0 }
  0x1f   :  { %787 = vmatpush3.bf16.msra.mxu0 %v929_v8  ;;  %919 = vmatpush3.bf16.msra.mxu1 %v929_v8 }
  0x22   :  { %789 = vmatmul.mubr.bf16.vlgmr.msra.gmra.mxu0 %v930_v9  ;;  %849 = vmatmul.mubr.bf16.vlgmr.msra.gmra.mxu1 %v931_v10 }
  0x23   :  { %792 = vmatprep.mubr.msk.bf16.mxu0 %vm960_vm0, %v959_v0  ;;  %852 = vmatprep.mubr.msk.bf16.mxu1 %vm960_vm0, %v959_v0 }
  0x2a   :  { %793 = vmatmul.mubr.bf16.gmra.mxu0 %v932_v11  ;;  %853 = vmatmul.mubr.bf16.gmra.mxu1 %v933_v12 }
  0x2b   :  { %796 = vmatprep.mubr.msk.bf16.mxu0 %vm960_vm0, %v959_v0  ;;  %856 = vmatprep.mubr.msk.bf16.mxu1 %vm960_vm0, %v959_v0 }
  0x32   :  { %797 = vmatmul.mubr.bf16.gmra.mxu0 %v934_v13  ;;  %857 = vmatmul.mubr.bf16.gmra.mxu1 %v935_v14 }
  0x33   :  { %800 = vmatprep.mubr.msk.bf16.mxu0 %vm960_vm0, %v959_v0  ;;  %860 = vmatprep.mubr.msk.bf16.mxu1 %vm960_vm0, %v959_v0 }
  0x3a   :  { %801 = vmatmul.mubr.bf16.gmra.mxu0 %v936_v15  ;;  %861 = vmatmul.mubr.bf16.gmra.mxu1 %v937_v16 }
  0x3b   :  { %804 = vmatprep.mubr.msk.bf16.mxu0 %vm960_vm0, %v959_v0  ;;  %864 = vmatprep.mubr.msk.bf16.mxu1 %vm960_vm0, %v959_v0 }
  0x42   :  { %805 = vmatmul.mubr.bf16.gmra.mxu0 %v938_v17  ;;  %865 = vmatmul.mubr.bf16.gmra.mxu1 %v939_v18 }
  0x43   :  { %808 = vmatprep.mubr.msk.bf16.mxu0 %vm960_vm0, %v959_v0  ;;  %868 = vmatprep.mubr.msk.bf16.mxu1 %vm960_vm0, %v959_v0 }
  0x4a   :  { %809 = vmatmul.mubr.bf16.gmra.mxu0 %v940_v19  ;;  %869 = vmatmul.mubr.bf16.gmra.mxu1 %v941_v20 }
  0x4b   :  { %812 = vmatprep.mubr.msk.bf16.mxu0 %vm960_vm0, %v959_v0  ;;  %872 = vmatprep.mubr.msk.bf16.mxu1 %vm960_vm0, %v959_v0 }
  0x52   :  { %813 = vmatmul.mubr.bf16.gmra.mxu0 %v942_v21  ;;  %873 = vmatmul.mubr.bf16.gmra.mxu1 %v943_v22 }
  0x53   :  { %816 = vmatprep.mubr.msk.bf16.mxu0 %vm960_vm0, %v959_v0  ;;  %876 = vmatprep.mubr.msk.bf16.mxu1 %vm960_vm0, %v959_v0 }
  0x5a   :  { %817 = vmatmul.mubr.bf16.gmra.mxu0 %v944_v23  ;;  %877 = vmatmul.mubr.bf16.gmra.mxu1 %v945_v24 }
  0x5b   :  { %820 = vmatprep.mubr.msk.bf16.mxu0 %vm960_vm0, %v959_v0  ;;  %880 = vmatprep.mubr.msk.bf16.mxu1 %vm960_vm0, %v959_v0 }
  0x62   :  { %821 = vmatmul.mubr.bf16.gmra.mxu0 %v946_v25  ;;  %881 = vmatmul.mubr.bf16.gmra.mxu1 %v947_v26 }
  0x63   :  { %824 = vmatprep.mubr.msk.bf16.mxu0 %vm960_vm0, %v959_v0  ;;  %884 = vmatprep.mubr.msk.bf16.mxu1 %vm960_vm0, %v959_v0 }
  0x6a   :  { %825 = vmatmul.mubr.bf16.gmra.mxu0 %v948_v27  ;;  %885 = vmatmul.mubr.bf16.gmra.mxu1 %v949_v28 }
  0x6b   :  { %828 = vmatprep.mubr.msk.bf16.mxu0 %vm960_vm0, %v959_v0  ;;  %888 = vmatprep.mubr.msk.bf16.mxu1 %vm960_vm0, %v959_v0 }
  0x72   :  { %829 = vmatmul.mubr.bf16.gmra.mxu0 %v950_v29  ;;  %889 = vmatmul.mubr.bf16.gmra.mxu1 %v951_v30 }
  0x73   :  { %832 = vmatprep.mubr.msk.bf16.mxu0 %vm960_vm0, %v959_v0  ;;  %892 = vmatprep.mubr.msk.bf16.mxu1 %vm960_vm0, %v959_v0 }
  0x7a   :  { %833 = vmatmul.mubr.bf16.gmra.mxu0 %v952_v31  ;;  %893 = vmatmul.mubr.bf16.gmra.mxu1 %v953_v32 }
  0x7b   :  { %836 = vmatprep.mubr.msk.bf16.mxu0 %vm960_vm0, %v959_v0  ;;  %896 = vmatprep.mubr.msk.bf16.mxu1 %vm960_vm0, %v959_v0 }
  0x82   :  { %837 = vmatmul.mubr.bf16.gmra.mxu0 %v954_v33  ;;  %897 = vmatmul.mubr.bf16.gmra.mxu1 %v955_v34 }
  0x83   :  { %840 = vmatprep.mubr.msk.bf16.mxu0 %vm960_vm0, %v959_v0  ;;  %900 = vmatprep.mubr.msk.bf16.mxu1 %vm960_vm0, %v959_v0 }
  0x8a   :  { %841 = vmatmul.mubr.bf16.gmra.mxu0 %v956_v35  ;;  %901 = vmatmul.mubr.bf16.gmra.mxu1 %v957_v36 }
  0x8b   :  { %844 = vmatprep.mubr.msk.bf16.mxu0 %vm960_vm0, %v959_v0 }
  0x92   :  { %845 = vmatmul.mubr.bf16.gmra.mxu0 %v958_v37 }
  0xe2   :  { %v349_v39 = vpop.f32.mrf.mxu0  ;;  %v469_v40 = vpop.f32.mrf.mxu1 }
  0xe3   :  { %v350_v41 = vadd.f32 %v1169_v38, %v349_v39  ;;  %v470_v42 = vadd.f32 %v1169_v38, %v469_v40 }
  0xe4   :  { %v790_v43 = vpop.f32.mrf.mxu0  ;;  %v850_v44 = vpop.f32.mrf.mxu1 }
  0xe5   :  { %v579_v45 = vmax.f32 %v350_v41, 0.0  ;;  %v609_v46 = vmax.f32 %v470_v42, 0.0 }
  0xe6   :  { %v352_v47 = vpop.f32.mrf.mxu0  ;;  %v472_v48 = vpop.f32.mrf.mxu1 }
  0xe7   :  { %636 = vst [vmem:[%s1402_s3] sm:$0xff] %v579_v45  ;;  %v353_v49 = vadd.f32 %v1169_v38, %v352_v47  ;;  %666 = vst [vmem:[%s1402_s3 + $0xf0] sm:$0xff] %v609_v46  ;;  %v473_v50 = vadd.f32 %v1169_v38, %v472_v48 }
  0xe8   :  { %v791_v51 = vpop.f32.mrf.mxu0  ;;  %v851_v52 = vpop.f32.mrf.mxu1 }
  0xe9   :  { %v580_v53 = vmax.f32 %v353_v49, 0.0  ;;  %v610_v54 = vmax.f32 %v473_v50, 0.0 }
  0xea   :  { %v357_v55 = vpop.f32.mrf.mxu0  ;;  %v477_v56 = vpop.f32.mrf.mxu1 }
  0xeb   :  { %637 = vst [vmem:[%s1402_s3 + $0x8] sm:$0xff] %v580_v53  ;;  %v358_v57 = vadd.f32 %v1169_v38, %v357_v55  ;;  %667 = vst [vmem:[%s1402_s3 + $0xf8] sm:$0xff] %v610_v54  ;;  %v478_v58 = vadd.f32 %v1169_v38, %v477_v56 }
  0xec   :  { %v794_v59 = vpop.f32.mrf.mxu0  ;;  %v854_v60 = vpop.f32.mrf.mxu1 }
  0xed   :  { %v581_v61 = vmax.f32 %v358_v57, 0.0  ;;  %v611_v62 = vmax.f32 %v478_v58, 0.0 }
  0xee   :  { %v360_v63 = vpop.f32.mrf.mxu0  ;;  %v480_v0 = vpop.f32.mrf.mxu1 }
  0xef   :  { %638 = vst [vmem:[%s1402_s3 + $0x10] sm:$0xff] %v581_v61  ;;  %v361_v1 = vadd.f32 %v1169_v38, %v360_v63  ;;  %668 = vst [vmem:[%s1402_s3 + $0x100] sm:$0xff] %v611_v62  ;;  %v481_v2 = vadd.f32 %v1169_v38, %v480_v0 }
  0xf0   :  { %v795_v3 = vpop.f32.mrf.mxu0  ;;  %v855_v4 = vpop.f32.mrf.mxu1 }
  0xf1   :  { %v582_v5 = vmax.f32 %v361_v1, 0.0  ;;  %v612_v6 = vmax.f32 %v481_v2, 0.0 }
  0xf2   :  { %v365_v7 = vpop.f32.mrf.mxu0  ;;  %v485_v8 = vpop.f32.mrf.mxu1 }
  0xf3   :  { %639 = vst [vmem:[%s1402_s3 + $0x18] sm:$0xff] %v582_v5  ;;  %v366_v9 = vadd.f32 %v1169_v38, %v365_v7  ;;  %669 = vst [vmem:[%s1402_s3 + $0x108] sm:$0xff] %v612_v6  ;;  %v486_v10 = vadd.f32 %v1169_v38, %v485_v8 }
  0xf4   :  { %v798_v11 = vpop.f32.mrf.mxu0  ;;  %v858_v12 = vpop.f32.mrf.mxu1 }
  0xf5   :  { %v583_v13 = vmax.f32 %v366_v9, 0.0  ;;  %v613_v14 = vmax.f32 %v486_v10, 0.0 }
  0xf6   :  { %v368_v15 = vpop.f32.mrf.mxu0  ;;  %v488_v16 = vpop.f32.mrf.mxu1 }
  0xf7   :  { %640 = vst [vmem:[%s1402_s3 + $0x20] sm:$0xff] %v583_v13  ;;  %v369_v17 = vadd.f32 %v1169_v38, %v368_v15  ;;  %670 = vst [vmem:[%s1402_s3 + $0x110] sm:$0xff] %v613_v14  ;;  %v489_v18 = vadd.f32 %v1169_v38, %v488_v16 }
  0xf8   :  { %v799_v19 = vpop.f32.mrf.mxu0  ;;  %v859_v20 = vpop.f32.mrf.mxu1 }
  0xf9   :  { %v584_v21 = vmax.f32 %v369_v17, 0.0  ;;  %v614_v22 = vmax.f32 %v489_v18, 0.0 }
  0xfa   :  { %v373_v23 = vpop.f32.mrf.mxu0  ;;  %v493_v24 = vpop.f32.mrf.mxu1 }
  0xfb   :  { %641 = vst [vmem:[%s1402_s3 + $0x28] sm:$0xff] %v584_v21  ;;  %v374_v25 = vadd.f32 %v1169_v38, %v373_v23  ;;  %671 = vst [vmem:[%s1402_s3 + $0x118] sm:$0xff] %v614_v22  ;;  %v494_v26 = vadd.f32 %v1169_v38, %v493_v24 }
  0xfc   :  { %v802_v27 = vpop.f32.mrf.mxu0  ;;  %v862_v28 = vpop.f32.mrf.mxu1 }
  0xfd   :  { %v585_v29 = vmax.f32 %v374_v25, 0.0  ;;  %v615_v30 = vmax.f32 %v494_v26, 0.0 }
  0xfe   :  { %v376_v31 = vpop.f32.mrf.mxu0  ;;  %v496_v32 = vpop.f32.mrf.mxu1 }
  0xff   :  { %642 = vst [vmem:[%s1402_s3 + $0x30] sm:$0xff] %v585_v29  ;;  %v377_v33 = vadd.f32 %v1169_v38, %v376_v31  ;;  %672 = vst [vmem:[%s1402_s3 + $0x120] sm:$0xff] %v615_v30  ;;  %v497_v34 = vadd.f32 %v1169_v38, %v496_v32 }
 0x100   :  { %v803_v35 = vpop.f32.mrf.mxu0  ;;  %v863_v36 = vpop.f32.mrf.mxu1 }
 0x101   :  { %v586_v37 = vmax.f32 %v377_v33, 0.0  ;;  %v616_v39 = vmax.f32 %v497_v34, 0.0 }
 0x102   :  { %v381_v40 = vpop.f32.mrf.mxu0  ;;  %v501_v41 = vpop.f32.mrf.mxu1 }
 0x103   :  { %643 = vst [vmem:[%s1402_s3 + $0x38] sm:$0xff] %v586_v37  ;;  %v382_v42 = vadd.f32 %v1169_v38, %v381_v40  ;;  %673 = vst [vmem:[%s1402_s3 + $0x128] sm:$0xff] %v616_v39  ;;  %v502_v43 = vadd.f32 %v1169_v38, %v501_v41 }
 0x104   :  { %v806_v44 = vpop.f32.mrf.mxu0  ;;  %v866_v45 = vpop.f32.mrf.mxu1 }
 0x105   :  { %v587_v46 = vmax.f32 %v382_v42, 0.0  ;;  %v617_v47 = vmax.f32 %v502_v43, 0.0 }
 0x106   :  { %v384_v48 = vpop.f32.mrf.mxu0  ;;  %v504_v49 = vpop.f32.mrf.mxu1 }
 0x107   :  { %644 = vst [vmem:[%s1402_s3 + $0x40] sm:$0xff] %v587_v46  ;;  %v385_v50 = vadd.f32 %v1169_v38, %v384_v48  ;;  %674 = vst [vmem:[%s1402_s3 + $0x130] sm:$0xff] %v617_v47  ;;  %v505_v51 = vadd.f32 %v1169_v38, %v504_v49 }
 0x108   :  { %v807_v52 = vpop.f32.mrf.mxu0  ;;  %v867_v53 = vpop.f32.mrf.mxu1 }
 0x109   :  { %v588_v54 = vmax.f32 %v385_v50, 0.0  ;;  %v618_v55 = vmax.f32 %v505_v51, 0.0 }
 0x10a   :  { %v389_v56 = vpop.f32.mrf.mxu0  ;;  %v509_v57 = vpop.f32.mrf.mxu1 }
 0x10b   :  { %645 = vst [vmem:[%s1402_s3 + $0x48] sm:$0xff] %v588_v54  ;;  %v390_v58 = vadd.f32 %v1169_v38, %v389_v56  ;;  %675 = vst [vmem:[%s1402_s3 + $0x138] sm:$0xff] %v618_v55  ;;  %v510_v59 = vadd.f32 %v1169_v38, %v509_v57 }
 0x10c   :  { %v810_v60 = vpop.f32.mrf.mxu0  ;;  %v870_v61 = vpop.f32.mrf.mxu1 }
 0x10d   :  { %v589_v62 = vmax.f32 %v390_v58, 0.0  ;;  %v619_v63 = vmax.f32 %v510_v59, 0.0 }
 0x10e   :  { %v392_v0 = vpop.f32.mrf.mxu0  ;;  %v512_v1 = vpop.f32.mrf.mxu1 }
 0x10f   :  { %646 = vst [vmem:[%s1402_s3 + $0x50] sm:$0xff] %v589_v62  ;;  %v393_v2 = vadd.f32 %v1169_v38, %v392_v0  ;;  %676 = vst [vmem:[%s1402_s3 + $0x140] sm:$0xff] %v619_v63  ;;  %v513_v3 = vadd.f32 %v1169_v38, %v512_v1 }
 0x110   :  { %v811_v4 = vpop.f32.mrf.mxu0  ;;  %v871_v5 = vpop.f32.mrf.mxu1 }
 0x111   :  { %v590_v6 = vmax.f32 %v393_v2, 0.0  ;;  %v620_v7 = vmax.f32 %v513_v3, 0.0 }
 0x112   :  { %v397_v8 = vpop.f32.mrf.mxu0  ;;  %v517_v9 = vpop.f32.mrf.mxu1 }
 0x113   :  { %647 = vst [vmem:[%s1402_s3 + $0x58] sm:$0xff] %v590_v6  ;;  %v398_v10 = vadd.f32 %v1169_v38, %v397_v8  ;;  %677 = vst [vmem:[%s1402_s3 + $0x148] sm:$0xff] %v620_v7  ;;  %v518_v11 = vadd.f32 %v1169_v38, %v517_v9 }
 0x114   :  { %v814_v12 = vpop.f32.mrf.mxu0  ;;  %v874_v13 = vpop.f32.mrf.mxu1 }
 0x115   :  { %v591_v14 = vmax.f32 %v398_v10, 0.0  ;;  %v621_v15 = vmax.f32 %v518_v11, 0.0 }
 0x116   :  { %v400_v16 = vpop.f32.mrf.mxu0  ;;  %v520_v17 = vpop.f32.mrf.mxu1 }
 0x117   :  { %648 = vst [vmem:[%s1402_s3 + $0x60] sm:$0xff] %v591_v14  ;;  %v401_v18 = vadd.f32 %v1169_v38, %v400_v16  ;;  %678 = vst [vmem:[%s1402_s3 + $0x150] sm:$0xff] %v621_v15  ;;  %v521_v19 = vadd.f32 %v1169_v38, %v520_v17 }
 0x118   :  { %v815_v20 = vpop.f32.mrf.mxu0  ;;  %v875_v21 = vpop.f32.mrf.mxu1 }
 0x119   :  { %v592_v22 = vmax.f32 %v401_v18, 0.0  ;;  %v622_v23 = vmax.f32 %v521_v19, 0.0 }
 0x11a   :  { %v405_v24 = vpop.f32.mrf.mxu0  ;;  %v525_v25 = vpop.f32.mrf.mxu1 }
 0x11b   :  { %649 = vst [vmem:[%s1402_s3 + $0x68] sm:$0xff] %v592_v22  ;;  %v406_v26 = vadd.f32 %v1169_v38, %v405_v24  ;;  %679 = vst [vmem:[%s1402_s3 + $0x158] sm:$0xff] %v622_v23  ;;  %v526_v27 = vadd.f32 %v1169_v38, %v525_v25 }
 0x11c   :  { %v818_v28 = vpop.f32.mrf.mxu0  ;;  %v878_v29 = vpop.f32.mrf.mxu1 }
 0x11d   :  { %v593_v30 = vmax.f32 %v406_v26, 0.0  ;;  %v623_v31 = vmax.f32 %v526_v27, 0.0 }
 0x11e   :  { %v408_v32 = vpop.f32.mrf.mxu0  ;;  %v528_v33 = vpop.f32.mrf.mxu1 }
 0x11f   :  { %650 = vst [vmem:[%s1402_s3 + $0x70] sm:$0xff] %v593_v30  ;;  %v409_v34 = vadd.f32 %v1169_v38, %v408_v32  ;;  %680 = vst [vmem:[%s1402_s3 + $0x160] sm:$0xff] %v623_v31  ;;  %v529_v35 = vadd.f32 %v1169_v38, %v528_v33 }
 0x120   :  { %v819_v36 = vpop.f32.mrf.mxu0  ;;  %v879_v37 = vpop.f32.mrf.mxu1 }
 0x121   :  { %v594_v39 = vmax.f32 %v409_v34, 0.0  ;;  %v624_v40 = vmax.f32 %v529_v35, 0.0 }
 0x122   :  { %v413_v41 = vpop.f32.mrf.mxu0  ;;  %v533_v42 = vpop.f32.mrf.mxu1 }
 0x123   :  { %651 = vst [vmem:[%s1402_s3 + $0x78] sm:$0xff] %v594_v39  ;;  %v414_v43 = vadd.f32 %v1169_v38, %v413_v41  ;;  %681 = vst [vmem:[%s1402_s3 + $0x168] sm:$0xff] %v624_v40  ;;  %v534_v44 = vadd.f32 %v1169_v38, %v533_v42 }
 0x124   :  { %v822_v45 = vpop.f32.mrf.mxu0  ;;  %v882_v46 = vpop.f32.mrf.mxu1 }
 0x125   :  { %v595_v47 = vmax.f32 %v414_v43, 0.0  ;;  %v625_v48 = vmax.f32 %v534_v44, 0.0 }
 0x126   :  { %v416_v49 = vpop.f32.mrf.mxu0  ;;  %v536_v50 = vpop.f32.mrf.mxu1 }
 0x127   :  { %652 = vst [vmem:[%s1402_s3 + $0x80] sm:$0xff] %v595_v47  ;;  %v417_v51 = vadd.f32 %v1169_v38, %v416_v49  ;;  %682 = vst [vmem:[%s1402_s3 + $0x170] sm:$0xff] %v625_v48  ;;  %v537_v52 = vadd.f32 %v1169_v38, %v536_v50 }
 0x128   :  { %v823_v53 = vpop.f32.mrf.mxu0  ;;  %v883_v54 = vpop.f32.mrf.mxu1 }
 0x129   :  { %v596_v55 = vmax.f32 %v417_v51, 0.0  ;;  %v626_v56 = vmax.f32 %v537_v52, 0.0 }
 0x12a   :  { %v421_v57 = vpop.f32.mrf.mxu0  ;;  %v541_v58 = vpop.f32.mrf.mxu1 }
 0x12b   :  { %653 = vst [vmem:[%s1402_s3 + $0x88] sm:$0xff] %v596_v55  ;;  %v422_v59 = vadd.f32 %v1169_v38, %v421_v57  ;;  %683 = vst [vmem:[%s1402_s3 + $0x178] sm:$0xff] %v626_v56  ;;  %v542_v60 = vadd.f32 %v1169_v38, %v541_v58 }
 0x12c   :  { %v826_v61 = vpop.f32.mrf.mxu0  ;;  %v886_v62 = vpop.f32.mrf.mxu1 }
 0x12d   :  { %v597_v63 = vmax.f32 %v422_v59, 0.0  ;;  %v627_v0 = vmax.f32 %v542_v60, 0.0 }
 0x12e   :  { %v424_v1 = vpop.f32.mrf.mxu0  ;;  %v544_v2 = vpop.f32.mrf.mxu1 }
 0x12f   :  { %654 = vst [vmem:[%s1402_s3 + $0x90] sm:$0xff] %v597_v63  ;;  %v425_v3 = vadd.f32 %v1169_v38, %v424_v1  ;;  %684 = vst [vmem:[%s1402_s3 + $0x180] sm:$0xff] %v627_v0  ;;  %v545_v4 = vadd.f32 %v1169_v38, %v544_v2 }
 0x130   :  { %v827_v5 = vpop.f32.mrf.mxu0  ;;  %v887_v6 = vpop.f32.mrf.mxu1 }
 0x131   :  { %v598_v7 = vmax.f32 %v425_v3, 0.0  ;;  %v628_v8 = vmax.f32 %v545_v4, 0.0 }
 0x132   :  { %v429_v9 = vpop.f32.mrf.mxu0  ;;  %v549_v10 = vpop.f32.mrf.mxu1 }
 0x133   :  { %655 = vst [vmem:[%s1402_s3 + $0x98] sm:$0xff] %v598_v7  ;;  %v430_v11 = vadd.f32 %v1169_v38, %v429_v9  ;;  %685 = vst [vmem:[%s1402_s3 + $0x188] sm:$0xff] %v628_v8  ;;  %v550_v12 = vadd.f32 %v1169_v38, %v549_v10 }
 0x134   :  { %v830_v13 = vpop.f32.mrf.mxu0  ;;  %v890_v14 = vpop.f32.mrf.mxu1 }
 0x135   :  { %v599_v15 = vmax.f32 %v430_v11, 0.0  ;;  %v629_v16 = vmax.f32 %v550_v12, 0.0 }
 0x136   :  { %v432_v17 = vpop.f32.mrf.mxu0  ;;  %v552_v18 = vpop.f32.mrf.mxu1 }
 0x137   :  { %656 = vst [vmem:[%s1402_s3 + $0xa0] sm:$0xff] %v599_v15  ;;  %v433_v19 = vadd.f32 %v1169_v38, %v432_v17  ;;  %686 = vst [vmem:[%s1402_s3 + $0x190] sm:$0xff] %v629_v16  ;;  %v553_v20 = vadd.f32 %v1169_v38, %v552_v18 }
 0x138   :  { %v831_v21 = vpop.f32.mrf.mxu0  ;;  %v891_v22 = vpop.f32.mrf.mxu1 }
 0x139   :  { %v600_v23 = vmax.f32 %v433_v19, 0.0  ;;  %v630_v24 = vmax.f32 %v553_v20, 0.0 }
 0x13a   :  { %v437_v25 = vpop.f32.mrf.mxu0  ;;  %v557_v26 = vpop.f32.mrf.mxu1 }
 0x13b   :  { %657 = vst [vmem:[%s1402_s3 + $0xa8] sm:$0xff] %v600_v23  ;;  %v438_v27 = vadd.f32 %v1169_v38, %v437_v25  ;;  %687 = vst [vmem:[%s1402_s3 + $0x198] sm:$0xff] %v630_v24  ;;  %v558_v28 = vadd.f32 %v1169_v38, %v557_v26 }
 0x13c   :  { %v834_v29 = vpop.f32.mrf.mxu0  ;;  %v894_v30 = vpop.f32.mrf.mxu1 }
 0x13d   :  { %v601_v31 = vmax.f32 %v438_v27, 0.0  ;;  %v631_v32 = vmax.f32 %v558_v28, 0.0 }
 0x13e   :  { %v440_v33 = vpop.f32.mrf.mxu0  ;;  %v560_v34 = vpop.f32.mrf.mxu1 }
 0x13f   :  { %658 = vst [vmem:[%s1402_s3 + $0xb0] sm:$0xff] %v601_v31  ;;  %v441_v35 = vadd.f32 %v1169_v38, %v440_v33  ;;  %688 = vst [vmem:[%s1402_s3 + $0x1a0] sm:$0xff] %v631_v32  ;;  %v561_v36 = vadd.f32 %v1169_v38, %v560_v34 }
 0x140   :  { %v835_v37 = vpop.f32.mrf.mxu0  ;;  %v895_v39 = vpop.f32.mrf.mxu1 }
 0x141   :  { %v602_v40 = vmax.f32 %v441_v35, 0.0  ;;  %v632_v41 = vmax.f32 %v561_v36, 0.0 }
 0x142   :  { %v445_v42 = vpop.f32.mrf.mxu0  ;;  %v565_v43 = vpop.f32.mrf.mxu1 }
 0x143   :  { %659 = vst [vmem:[%s1402_s3 + $0xb8] sm:$0xff] %v602_v40  ;;  %v446_v44 = vadd.f32 %v1169_v38, %v445_v42  ;;  %689 = vst [vmem:[%s1402_s3 + $0x1a8] sm:$0xff] %v632_v41  ;;  %v566_v45 = vadd.f32 %v1169_v38, %v565_v43 }
 0x144   :  { %v838_v46 = vpop.f32.mrf.mxu0  ;;  %v898_v47 = vpop.f32.mrf.mxu1 }
 0x145   :  { %v603_v48 = vmax.f32 %v446_v44, 0.0  ;;  %v633_v49 = vmax.f32 %v566_v45, 0.0 }
 0x146   :  { %v448_v50 = vpop.f32.mrf.mxu0  ;;  %v568_v51 = vpop.f32.mrf.mxu1 }
 0x147   :  { %660 = vst [vmem:[%s1402_s3 + $0xc0] sm:$0xff] %v603_v48  ;;  %v449_v52 = vadd.f32 %v1169_v38, %v448_v50  ;;  %690 = vst [vmem:[%s1402_s3 + $0x1b0] sm:$0xff] %v633_v49  ;;  %v569_v53 = vadd.f32 %v1169_v38, %v568_v51 }
 0x148   :  { %v839_v54 = vpop.f32.mrf.mxu0  ;;  %v899_v55 = vpop.f32.mrf.mxu1 }
 0x149   :  { %v604_v56 = vmax.f32 %v449_v52, 0.0  ;;  %v634_v57 = vmax.f32 %v569_v53, 0.0 }
 0x14a   :  { %v453_v58 = vpop.f32.mrf.mxu0  ;;  %v573_v59 = vpop.f32.mrf.mxu1 }
 0x14b   :  { %661 = vst [vmem:[%s1402_s3 + $0xc8] sm:$0xff] %v604_v56  ;;  %v454_v60 = vadd.f32 %v1169_v38, %v453_v58  ;;  %691 = vst [vmem:[%s1402_s3 + $0x1b8] sm:$0xff] %v634_v57  ;;  %v574_v61 = vadd.f32 %v1169_v38, %v573_v59 }
 0x14c   :  { %v842_v62 = vpop.f32.mrf.mxu0  ;;  %v902_v63 = vpop.f32.mrf.mxu1 }
 0x14d   :  { %v605_v0 = vmax.f32 %v454_v60, 0.0  ;;  %v635_v1 = vmax.f32 %v574_v61, 0.0 }
 0x14e   :  { %v456_v2 = vpop.f32.mrf.mxu0  ;;  %v576_v3 = vpop.f32.mrf.mxu1 }
 0x14f   :  { %662 = vst [vmem:[%s1402_s3 + $0xd0] sm:$0xff] %v605_v0  ;;  %v457_v4 = vadd.f32 %v1169_v38, %v456_v2  ;;  %692 = vst [vmem:[%s1402_s3 + $0x1c0] sm:$0x3] %v635_v1 }
 0x150   :  { %v843_v5 = vpop.f32.mrf.mxu0  ;;  %v903_v6 = vpop.f32.mrf.mxu1 }
 0x151   :  { %v606_v7 = vmax.f32 %v457_v4, 0.0 }
 0x152   :  { %v461_v8 = vpop.f32.mrf.mxu0 }
 0x153   :  { %663 = vst [vmem:[%s1402_s3 + $0xd8] sm:$0xff] %v606_v7  ;;  %v462_v9 = vadd.f32 %v1169_v38, %v461_v8 }
 0x154   :  { %v846_v10 = vpop.f32.mrf.mxu0 }
 0x155   :  { %v607_v11 = vmax.f32 %v462_v9, 0.0 }
 0x156   :  { %v464_v12 = vpop.f32.mrf.mxu0 }
 0x157   :  { %664 = vst [vmem:[%s1402_s3 + $0xe0] sm:$0xff] %v607_v11  ;;  %v465_v13 = vadd.f32 %v1169_v38, %v464_v12 }
 0x158   :  { %v847_v14 = vpop.f32.mrf.mxu0 }
 0x159   :  { %v608_v15 = vmax.f32 %v465_v13, 0.0 }
 0x15b   :  { %665 = vst [vmem:[%s1402_s3 + $0xe8] sm:$0xff] %v608_v15 }

// kernel: dqn_forward.5
= control target key start
LH: loop header
LB: loop body
LE: loop exit
PB: predicated region body
PF: predicated region fallthrough
CT: control target
= control target key end

     0   :  { %s972_s1 = inlined_call_operand.vmem [shape: bf16[512,128], index: 1, kind: input, shape index: {}]   ;;  %s973_s0 = inlined_call_operand.vmem [shape: bf16[72,512], index: 0, kind: input, shape index: {}]   ;;  %s974_s2 = inlined_call_operand.vmem [shape: f32[1,128], index: 2, kind: input, shape index: {}]   ;;  %s975_s3 = inlined_call_operand.vmem [shape: f32[72,128], index: 3, kind: output, shape index: {}]  }
   0x1   :  { %v701_v0 = vld [vmem:[%s972_s1 + $0x78] sm:$0xff]   ;;  %v705_v4 = vld [vmem:[%s972_s1 + $0x70] sm:$0xff]   ;;  %v709_v8 = vld [vmem:[%s972_s1 + $0x68] sm:$0xff]  }
   0x2   :  { %v702_v1 = vld [vmem:[%s972_s1 + $0xf8] sm:$0xff]   ;;  %609 = vmatprep.subr.bf16.mxu0 %v701_v0  ;;  %v706_v5 = vld [vmem:[%s972_s1 + $0xf0] sm:$0xff]   ;;  %v710_v9 = vld [vmem:[%s972_s1 + $0xe8] sm:$0xff]  }
   0x3   :  { %v703_v2 = vld [vmem:[%s972_s1 + $0x38] sm:$0xff]   ;;  %655 = vmatprep.subr.bf16.mxu1 %v702_v1  ;;  %v707_v6 = vld [vmem:[%s972_s1 + $0x30] sm:$0xff]   ;;  %v711_v10 = vld [vmem:[%s972_s1 + $0x28] sm:$0xff]  }
   0x4   :  { %v704_v3 = vld [vmem:[%s972_s1 + $0xb8] sm:$0xff]   ;;  %610 = vmatpush3.bf16.msra.mxu0 %v703_v2  ;;  %v708_v7 = vld [vmem:[%s972_s1 + $0xb0] sm:$0xff]   ;;  %v712_v11 = vld [vmem:[%s972_s1 + $0xa8] sm:$0xff]  }
   0x5   :  { %656 = vmatpush3.bf16.msra.mxu1 %v704_v3  ;;  %611 = vmatprep.subr.bf16.mxu0 %v705_v4  ;;  %v713_v12 = vld [vmem:[%s972_s1 + $0x60] sm:$0xff]   ;;  %v717_v16 = vld [vmem:[%s972_s1 + $0x58] sm:$0xff]   ;;  %v721_v20 = vld [vmem:[%s972_s1 + $0x50] sm:$0xff]  }
   0x6   :  { %657 = vmatprep.subr.bf16.mxu1 %v706_v5  ;;  %v714_v13 = vld [vmem:[%s972_s1 + $0xe0] sm:$0xff]   ;;  %v718_v17 = vld [vmem:[%s972_s1 + $0xd8] sm:$0xff]   ;;  %v722_v21 = vld [vmem:[%s972_s1 + $0xd0] sm:$0xff]  }
   0x7   :  { %v715_v14 = vld [vmem:[%s972_s1 + $0x20] sm:$0xff]   ;;  %v719_v18 = vld [vmem:[%s972_s1 + $0x18] sm:$0xff]   ;;  %v723_v22 = vld [vmem:[%s972_s1 + $0x10] sm:$0xff]  }
   0x8   :  { %612 = vmatpush3.bf16.msra.mxu0 %v707_v6  ;;  %v716_v15 = vld [vmem:[%s972_s1 + $0xa0] sm:$0xff]   ;;  %v720_v19 = vld [vmem:[%s972_s1 + $0x98] sm:$0xff]   ;;  %v724_v23 = vld [vmem:[%s972_s1 + $0x90] sm:$0xff]  }
   0x9   :  { %658 = vmatpush3.bf16.msra.mxu1 %v708_v7  ;;  %613 = vmatprep.subr.bf16.mxu0 %v709_v8  ;;  %v725_v24 = vld [vmem:[%s972_s1 + $0x48] sm:$0xff]   ;;  %v729_v28 = vld [vmem:[%s972_s1 + $0x40] sm:$0xff]  }
   0xa   :  { %659 = vmatprep.subr.bf16.mxu1 %v710_v9  ;;  %v726_v25 = vld [vmem:[%s972_s1 + $0xc8] sm:$0xff]   ;;  %v730_v29 = vld [vmem:[%s972_s1 + $0xc0] sm:$0xff]  }
   0xb   :  { %v727_v26 = vld [vmem:[%s972_s1 + $0x8] sm:$0xff]   ;;  %v731_v30 = vld [vmem:[%s972_s1] sm:$0xff]  }
   0xc   :  { %614 = vmatpush3.bf16.msra.mxu0 %v711_v10  ;;  %v728_v27 = vld [vmem:[%s972_s1 + $0x88] sm:$0xff]   ;;  %v732_v31 = vld [vmem:[%s972_s1 + $0x80] sm:$0xff]  }
   0xd   :  { %660 = vmatpush3.bf16.msra.mxu1 %v712_v11  ;;  %615 = vmatprep.subr.bf16.mxu0 %v713_v12  ;;  %v733_v32 = vld [vmem:[%s973_s0] ss:$16 sps:$4 sm:$0xff]   ;;  %v735_v33 = vld [vmem:[%s973_s0 + $0x4] ss:$16 sps:$4 sm:$0xff]   ;;  %v736_v34 = vld [vmem:[%s973_s0 + $0x8] ss:$16 sps:$4 sm:$0xff]  }
   0xe   :  { %661 = vmatprep.subr.bf16.mxu1 %v714_v13  ;;  %v738_v35 = vld [vmem:[%s973_s0 + $0xc] ss:$16 sps:$4 sm:$0xff]   ;;  %422 = vmatprep.mubr.bf16.mxu0 %v735_v33  ;;  %v739_v36 = vld [vmem:[%s973_s0 + $0x24] ss:$16 sps:$4 sm:$0xff]   ;;  %v743_v38 = vld [vmem:[%s973_s0 + $0x20] ss:$16 sps:$4 sm:$0xff]  }
   0xf   :  { %494 = vmatprep.mubr.bf16.mxu1 %v738_v35  ;;  %v741_v37 = vld [vmem:[%s973_s0 + $0x2c] ss:$16 sps:$4 sm:$0xff]   ;;  %v744_v39 = vld [vmem:[%s973_s0 + $0x28] ss:$16 sps:$4 sm:$0xff]   ;;  %v745_v40 = vld [vmem:[%s973_s0 + $0x44] ss:$16 sps:$4 sm:$0xff]  }
  0x10   :  { %616 = vmatpush3.bf16.msra.mxu0 %v715_v14  ;;  %v747_v41 = vld [vmem:[%s973_s0 + $0x4c] ss:$16 sps:$4 sm:$0xff]   ;;  %v749_v42 = vld [vmem:[%s973_s0 + $0x40] ss:$16 sps:$4 sm:$0xff]   ;;  %v750_v43 = vld [vmem:[%s973_s0 + $0x48] ss:$16 sps:$4 sm:$0xff]  }
  0x11   :  { %662 = vmatpush3.bf16.msra.mxu1 %v716_v15  ;;  %617 = vmatprep.subr.bf16.mxu0 %v717_v16  ;;  %v751_v44 = vld [vmem:[%s973_s0 + $0x64] ss:$16 sps:$4 sm:$0xff]   ;;  %v753_v45 = vld [vmem:[%s973_s0 + $0x6c] ss:$16 sps:$4 sm:$0xff]   ;;  %v755_v48 = vld [vmem:[%s973_s0 + $0x60] ss:$16 sps:$4 sm:$0xff]  }
  0x12   :  { %663 = vmatprep.subr.bf16.mxu1 %v718_v17  ;;  %v31_v46 = vld [vmem:[%s973_s0 + $0x80] sm:$0xff]  ;;  %v32_v47 = vld [vmem:[%s973_s0 + $0x88] sm:$0xff] }
  0x13   :  { %v756_v49 = vld [vmem:[%s973_s0 + $0x68] ss:$16 sps:$4 sm:$0xff]   ;;  %v574_v50 = vcombine.high %v31_v46, %v31_v46  ;;  %v576_v51 = vcombine.high %v32_v47, %v32_v47  ;;  %v573_v52 = vcombine.low %v31_v46, %v31_v46  ;;  %v575_v53 = vcombine.low %v32_v47, %v32_v47  ;;  %v934_v56 = vld [vmem:[%s974_s2] ss:$0 sm:$0xff] }
  0x14   :  { %618 = vmatpush3.bf16.msra.mxu0 %v719_v18 }
  0x15   :  { %664 = vmatpush3.bf16.msra.mxu1 %v720_v19  ;;  %619 = vmatprep.subr.bf16.mxu0 %v721_v20 }
  0x16   :  { %665 = vmatprep.subr.bf16.mxu1 %v722_v21 }
  0x18   :  { %620 = vmatpush3.bf16.msra.mxu0 %v723_v22 }
  0x19   :  { %666 = vmatpush3.bf16.msra.mxu1 %v724_v23  ;;  %621 = vmatprep.subr.bf16.mxu0 %v725_v24 }
  0x1a   :  { %667 = vmatprep.subr.bf16.mxu1 %v726_v25 }
  0x1c   :  { %622 = vmatpush3.bf16.msra.mxu0 %v727_v26 }
  0x1d   :  { %668 = vmatpush3.bf16.msra.mxu1 %v728_v27  ;;  %623 = vmatprep.subr.bf16.mxu0 %v729_v28 }
  0x1e   :  { %669 = vmatprep.subr.bf16.mxu1 %v730_v29 }
  0x20   :  { %624 = vmatpush3.bf16.msra.mxu0 %v731_v30 }
  0x21   :  { %670 = vmatpush3.bf16.msra.mxu1 %v732_v31 }
  0x23   :  { %423 = vmatmul.mubr.bf16.vlgmr.msra.gmra.mxu0 %v733_v32 }
  0x24   :  { %495 = vmatmul.mubr.bf16.vlgmr.msra.gmra.mxu1 %v736_v34  ;;  %430 = vmatprep.mubr.bf16.mxu0 %v739_v36 }
  0x25   :  { %502 = vmatprep.mubr.bf16.mxu1 %v741_v37 }
  0x2b   :  { %431 = vmatmul.mubr.bf16.gmra.mxu0 %v743_v38 }
  0x2c   :  { %503 = vmatmul.mubr.bf16.gmra.mxu1 %v744_v39  ;;  %438 = vmatprep.mubr.bf16.mxu0 %v745_v40 }
  0x2d   :  { %510 = vmatprep.mubr.bf16.mxu1 %v747_v41 }
  0x33   :  { %439 = vmatmul.mubr.bf16.gmra.mxu0 %v749_v42 }
  0x34   :  { %511 = vmatmul.mubr.bf16.gmra.mxu1 %v750_v43  ;;  %446 = vmatprep.mubr.bf16.mxu0 %v751_v44 }
  0x35   :  { %518 = vmatprep.mubr.bf16.mxu1 %v753_v45 }
  0x3b   :  { %447 = vmatmul.mubr.bf16.gmra.mxu0 %v755_v48 }
  0x3c   :  { %519 = vmatmul.mubr.bf16.gmra.mxu1 %v756_v49  ;;  %454 = vmatprep.mubr.bf16.mxu0 %v574_v50 }
  0x3d   :  { %526 = vmatprep.mubr.bf16.mxu1 %v576_v51 }
  0x43   :  { %455 = vmatmul.mubr.bf16.gmra.mxu0 %v573_v52 }
  0x44   :  { %527 = vmatmul.mubr.bf16.gmra.mxu1 %v575_v53 }
  0xe3   :  { %v625_v54 = vpop.f32.mrf.mxu0 }
  0xe4   :  { %v671_v55 = vpop.f32.mrf.mxu1 }
  0xe5   :  { %v626_v57 = vpop.f32.mrf.mxu0 }
  0xe6   :  { %v627_v58 = vadd.f32 %v626_v57, %v625_v54  ;;  %v672_v59 = vpop.f32.mrf.mxu1 }
  0xe7   :  { %v628_v60 = vpop.f32.mrf.mxu0  ;;  %v673_v62 = vadd.f32 %v672_v59, %v671_v55 }
  0xe8   :  { %v425_v61 = vadd.f32 %v627_v58, %v934_v56  ;;  %v674_v63 = vpop.f32.mrf.mxu1 }
  0xe9   :  { %v629_v0 = vpop.f32.mrf.mxu0 }
  0xea   :  { %v497_v1 = vadd.f32 %v673_v62, %v425_v61  ;;  %v630_v2 = vadd.f32 %v629_v0, %v628_v60  ;;  %v675_v3 = vpop.f32.mrf.mxu1 }
  0xeb   :  { %v631_v4 = vpop.f32.mrf.mxu0  ;;  %v676_v7 = vadd.f32 %v675_v3, %v674_v63 }
  0xec   :  { %v534_v5 = vmax.f32 %v497_v1, 0.0  ;;  %v428_v6 = vadd.f32 %v630_v2, %v934_v56  ;;  %v677_v8 = vpop.f32.mrf.mxu1 }
  0xed   :  { %v632_v9 = vpop.f32.mrf.mxu0 }
  0xee   :  { %543 = vst [vmem:[%s975_s3] sm:$0xff] %v534_v5  ;;  %v500_v10 = vadd.f32 %v676_v7, %v428_v6  ;;  %v633_v11 = vadd.f32 %v632_v9, %v631_v4  ;;  %v678_v12 = vpop.f32.mrf.mxu1 }
  0xef   :  { %v634_v13 = vpop.f32.mrf.mxu0  ;;  %v679_v16 = vadd.f32 %v678_v12, %v677_v8 }
  0xf0   :  { %v535_v14 = vmax.f32 %v500_v10, 0.0  ;;  %v433_v15 = vadd.f32 %v633_v11, %v934_v56  ;;  %v680_v17 = vpop.f32.mrf.mxu1 }
  0xf1   :  { %v635_v18 = vpop.f32.mrf.mxu0 }
  0xf2   :  { %544 = vst [vmem:[%s975_s3 + $0x8] sm:$0xff] %v535_v14  ;;  %v505_v19 = vadd.f32 %v679_v16, %v433_v15  ;;  %v636_v20 = vadd.f32 %v635_v18, %v634_v13  ;;  %v681_v21 = vpop.f32.mrf.mxu1 }
  0xf3   :  { %v637_v22 = vpop.f32.mrf.mxu0  ;;  %v682_v25 = vadd.f32 %v681_v21, %v680_v17 }
  0xf4   :  { %v536_v23 = vmax.f32 %v505_v19, 0.0  ;;  %v436_v24 = vadd.f32 %v636_v20, %v934_v56  ;;  %v683_v26 = vpop.f32.mrf.mxu1 }
  0xf5   :  { %v638_v27 = vpop.f32.mrf.mxu0 }
  0xf6   :  { %545 = vst [vmem:[%s975_s3 + $0x10] sm:$0xff] %v536_v23  ;;  %v508_v28 = vadd.f32 %v682_v25, %v436_v24  ;;  %v639_v29 = vadd.f32 %v638_v27, %v637_v22  ;;  %v684_v30 = vpop.f32.mrf.mxu1 }
  0xf7   :  { %v640_v31 = vpop.f32.mrf.mxu0  ;;  %v685_v34 = vadd.f32 %v684_v30, %v683_v26 }
  0xf8   :  { %v537_v32 = vmax.f32 %v508_v28, 0.0  ;;  %v441_v33 = vadd.f32 %v639_v29, %v934_v56  ;;  %v686_v35 = vpop.f32.mrf.mxu1 }
  0xf9   :  { %v641_v36 = vpop.f32.mrf.mxu0 }
  0xfa   :  { %546 = vst [vmem:[%s975_s3 + $0x18] sm:$0xff] %v537_v32  ;;  %v513_v37 = vadd.f32 %v685_v34, %v441_v33  ;;  %v642_v38 = vadd.f32 %v641_v36, %v640_v31  ;;  %v687_v39 = vpop.f32.mrf.mxu1 }
  0xfb   :  { %v643_v40 = vpop.f32.mrf.mxu0  ;;  %v688_v43 = vadd.f32 %v687_v39, %v686_v35 }
  0xfc   :  { %v538_v41 = vmax.f32 %v513_v37, 0.0  ;;  %v444_v42 = vadd.f32 %v642_v38, %v934_v56  ;;  %v689_v44 = vpop.f32.mrf.mxu1 }
  0xfd   :  { %v644_v45 = vpop.f32.mrf.mxu0 }
  0xfe   :  { %547 = vst [vmem:[%s975_s3 + $0x20] sm:$0xff] %v538_v41  ;;  %v516_v46 = vadd.f32 %v688_v43, %v444_v42  ;;  %v645_v47 = vadd.f32 %v644_v45, %v643_v40  ;;  %v690_v48 = vpop.f32.mrf.mxu1 }
  0xff   :  { %v646_v49 = vpop.f32.mrf.mxu0  ;;  %v691_v52 = vadd.f32 %v690_v48, %v689_v44 }
 0x100   :  { %v539_v50 = vmax.f32 %v516_v46, 0.0  ;;  %v449_v51 = vadd.f32 %v645_v47, %v934_v56  ;;  %v692_v53 = vpop.f32.mrf.mxu1 }
 0x101   :  { %v647_v54 = vpop.f32.mrf.mxu0 }
 0x102   :  { %548 = vst [vmem:[%s975_s3 + $0x28] sm:$0xff] %v539_v50  ;;  %v521_v55 = vadd.f32 %v691_v52, %v449_v51  ;;  %v648_v57 = vadd.f32 %v647_v54, %v646_v49  ;;  %v693_v58 = vpop.f32.mrf.mxu1 }
 0x103   :  { %v649_v59 = vpop.f32.mrf.mxu0  ;;  %v694_v62 = vadd.f32 %v693_v58, %v692_v53 }
 0x104   :  { %v540_v60 = vmax.f32 %v521_v55, 0.0  ;;  %v452_v61 = vadd.f32 %v648_v57, %v934_v56  ;;  %v695_v63 = vpop.f32.mrf.mxu1 }
 0x105   :  { %v650_v0 = vpop.f32.mrf.mxu0 }
 0x106   :  { %549 = vst [vmem:[%s975_s3 + $0x30] sm:$0xff] %v540_v60  ;;  %v524_v1 = vadd.f32 %v694_v62, %v452_v61  ;;  %v651_v2 = vadd.f32 %v650_v0, %v649_v59  ;;  %v696_v3 = vpop.f32.mrf.mxu1 }
 0x107   :  { %v652_v4 = vpop.f32.mrf.mxu0  ;;  %v697_v7 = vadd.f32 %v696_v3, %v695_v63 }
 0x108   :  { %v541_v5 = vmax.f32 %v524_v1, 0.0  ;;  %v457_v6 = vadd.f32 %v651_v2, %v934_v56  ;;  %v698_v8 = vpop.f32.mrf.mxu1 }
 0x109   :  { %v653_v9 = vpop.f32.mrf.mxu0 }
 0x10a   :  { %550 = vst [vmem:[%s975_s3 + $0x38] sm:$0xff] %v541_v5  ;;  %v529_v10 = vadd.f32 %v697_v7, %v457_v6  ;;  %v699_v11 = vpop.f32.mrf.mxu1 }
 0x10c   :  { %v542_v12 = vmax.f32 %v529_v10, 0.0 }
 0x10e   :  { %551 = vst [vmem:[%s975_s3 + $0x40] sm:$0xff] %v542_v12 }

// kernel: dqn_forward.6
= control target key start
LH: loop header
LB: loop body
LE: loop exit
PB: predicated region body
PF: predicated region fallthrough
CT: control target
= control target key end

     0   :  { %s941_s1 = inlined_call_operand.vmem [shape: bf16[640,128], index: 1, kind: input, shape index: {}]   ;;  %s942_s0 = inlined_call_operand.vmem [shape: bf16[32,640], index: 0, kind: input, shape index: {}]   ;;  %s943_s2 = inlined_call_operand.vmem [shape: f32[1,128], index: 2, kind: input, shape index: {}]   ;;  %s944_s3 = inlined_call_operand.vmem [shape: f32[32,128], index: 3, kind: output, shape index: {}]  }
   0x1   :  { %v702_v0 = vld [vmem:[%s941_s1 + $0x78] sm:$0xff]   ;;  %v706_v4 = vld [vmem:[%s941_s1 + $0x70] sm:$0xff]   ;;  %v710_v8 = vld [vmem:[%s941_s1 + $0x68] sm:$0xff]  }
   0x2   :  { %v703_v1 = vld [vmem:[%s941_s1 + $0x38] sm:$0xff]   ;;  %616 = vmatprep.subr.bf16.mxu0 %v702_v0  ;;  %v707_v5 = vld [vmem:[%s941_s1 + $0x30] sm:$0xff]   ;;  %v711_v9 = vld [vmem:[%s941_s1 + $0x28] sm:$0xff]  }
   0x3   :  { %v704_v2 = vld [vmem:[%s941_s1 + $0xf8] sm:$0xff]   ;;  %617 = vmatpush3.bf16.msra.mxu0 %v703_v1  ;;  %v708_v6 = vld [vmem:[%s941_s1 + $0xf0] sm:$0xff]   ;;  %v712_v10 = vld [vmem:[%s941_s1 + $0xe8] sm:$0xff]  }
   0x4   :  { %v705_v3 = vld [vmem:[%s941_s1 + $0xb8] sm:$0xff]   ;;  %644 = vmatprep.subr.bf16.mxu1 %v704_v2  ;;  %618 = vmatprep.subr.bf16.mxu0 %v706_v4  ;;  %v709_v7 = vld [vmem:[%s941_s1 + $0xb0] sm:$0xff]   ;;  %v713_v11 = vld [vmem:[%s941_s1 + $0xa8] sm:$0xff]  }
   0x5   :  { %645 = vmatpush3.bf16.msra.mxu1 %v705_v3  ;;  %v714_v12 = vld [vmem:[%s941_s1 + $0x60] sm:$0xff]   ;;  %v718_v16 = vld [vmem:[%s941_s1 + $0x58] sm:$0xff]   ;;  %v722_v20 = vld [vmem:[%s941_s1 + $0x50] sm:$0xff]  }
   0x6   :  { %646 = vmatprep.subr.bf16.mxu1 %v708_v6  ;;  %v715_v13 = vld [vmem:[%s941_s1 + $0x20] sm:$0xff]   ;;  %v719_v17 = vld [vmem:[%s941_s1 + $0x18] sm:$0xff]   ;;  %v723_v21 = vld [vmem:[%s941_s1 + $0x10] sm:$0xff]  }
   0x7   :  { %619 = vmatpush3.bf16.msra.mxu0 %v707_v5  ;;  %v716_v14 = vld [vmem:[%s941_s1 + $0xe0] sm:$0xff]   ;;  %v720_v18 = vld [vmem:[%s941_s1 + $0xd8] sm:$0xff]   ;;  %v724_v22 = vld [vmem:[%s941_s1 + $0xd0] sm:$0xff]  }
   0x8   :  { %620 = vmatprep.subr.bf16.mxu0 %v710_v8  ;;  %v717_v15 = vld [vmem:[%s941_s1 + $0xa0] sm:$0xff]   ;;  %v721_v19 = vld [vmem:[%s941_s1 + $0x98] sm:$0xff]   ;;  %v725_v23 = vld [vmem:[%s941_s1 + $0x90] sm:$0xff]  }
   0x9   :  { %647 = vmatpush3.bf16.msra.mxu1 %v709_v7  ;;  %v726_v24 = vld [vmem:[%s941_s1 + $0x48] sm:$0xff]   ;;  %v730_v28 = vld [vmem:[%s941_s1 + $0x40] sm:$0xff]   ;;  %v737_v34 = vld [vmem:[%s941_s1 + $0x138] sm:$0xff]  }
   0xa   :  { %648 = vmatprep.subr.bf16.mxu1 %v712_v10  ;;  %v727_v25 = vld [vmem:[%s941_s1 + $0x8] sm:$0xff]   ;;  %v731_v29 = vld [vmem:[%s941_s1] sm:$0xff]   ;;  %v741_v37 = vld [vmem:[%s941_s1 + $0x130] sm:$0xff]  }
   0xb   :  { %621 = vmatpush3.bf16.msra.mxu0 %v711_v9  ;;  %v728_v26 = vld [vmem:[%s941_s1 + $0xc8] sm:$0xff]   ;;  %v732_v30 = vld [vmem:[%s941_s1 + $0xc0] sm:$0xff]   ;;  %v744_v44 = vld [vmem:[%s941_s1 + $0x118] sm:$0xff]  }
   0xc   :  { %622 = vmatprep.subr.bf16.mxu0 %v714_v12  ;;  %v729_v27 = vld [vmem:[%s941_s1 + $0x88] sm:$0xff]   ;;  %v733_v31 = vld [vmem:[%s942_s0] ss:$20 sps:$4 sm:$0xff]   ;;  %v735_v32 = vld [vmem:[%s942_s0 + $0x4] ss:$20 sps:$4 sm:$0xff]  }
   0xd   :  { %649 = vmatpush3.bf16.msra.mxu1 %v713_v11  ;;  %v736_v33 = vld [vmem:[%s941_s1 + $0x80] sm:$0xff]   ;;  %438 = vmatprep.mubr.bf16.mxu0 %v735_v32  ;;  %v738_v35 = vld [vmem:[%s942_s0 + $0x8] ss:$20 sps:$4 sm:$0xff]   ;;  %v751_v46 = vld [vmem:[%s941_s1 + $0x110] sm:$0xff]  }
   0xe   :  { %650 = vmatprep.subr.bf16.mxu1 %v716_v14  ;;  %v740_v36 = vld [vmem:[%s942_s0 + $0xc] ss:$20 sps:$4 sm:$0xff]   ;;  %v747_v41 = vld [vmem:[%s942_s0 + $0x28] ss:$20 sps:$4 sm:$0xff]   ;;  %v750_v43 = vld [vmem:[%s942_s0 + $0x30] ss:$20 sps:$4 sm:$0xff]  }
   0xf   :  { %623 = vmatpush3.bf16.msra.mxu0 %v715_v13  ;;  %487 = vmatprep.mubr.bf16.mxu1 %v740_v36  ;;  %v742_v38 = vld [vmem:[%s941_s1 + $0x128] sm:$0xff]   ;;  %v743_v39 = vld [vmem:[%s941_s1 + $0x120] sm:$0xff]  }
  0x10   :  { %624 = vmatprep.subr.bf16.mxu0 %v718_v16  ;;  %v745_v40 = vld [vmem:[%s942_s0 + $0x2c] ss:$20 sps:$4 sm:$0xff]   ;;  %v748_v42 = vld [vmem:[%s942_s0 + $0x34] ss:$20 sps:$4 sm:$0xff]   ;;  %v754_v45 = vld [vmem:[%s942_s0 + $0x10] ss:$20 sps:$4 sm:$0xff]  }
  0x11   :  { %651 = vmatpush3.bf16.msra.mxu1 %v717_v15  ;;  %v752_v47 = vld [vmem:[%s941_s1 + $0x108] sm:$0xff]   ;;  %v753_v48 = vld [vmem:[%s941_s1 + $0x100] sm:$0xff]  }
  0x12   :  { %652 = vmatprep.subr.bf16.mxu1 %v720_v18  ;;  %v755_v49 = vld [vmem:[%s942_s0 + $0x38] ss:$20 sps:$4 sm:$0xff]   ;;  %v565_v3 = vld [vmem:[%s943_s2] ss:$0 sm:$0xff] }
  0x13   :  { %625 = vmatpush3.bf16.msra.mxu0 %v719_v17 }
  0x14   :  { %626 = vmatprep.subr.bf16.mxu0 %v722_v20 }
  0x15   :  { %653 = vmatpush3.bf16.msra.mxu1 %v721_v19 }
  0x16   :  { %654 = vmatprep.subr.bf16.mxu1 %v724_v22 }
  0x17   :  { %627 = vmatpush3.bf16.msra.mxu0 %v723_v21 }
  0x18   :  { %628 = vmatprep.subr.bf16.mxu0 %v726_v24 }
  0x19   :  { %655 = vmatpush3.bf16.msra.mxu1 %v725_v23 }
  0x1a   :  { %656 = vmatprep.subr.bf16.mxu1 %v728_v26 }
  0x1b   :  { %629 = vmatpush3.bf16.msra.mxu0 %v727_v25 }
  0x1c   :  { %630 = vmatprep.subr.bf16.mxu0 %v730_v28 }
  0x1d   :  { %657 = vmatpush3.bf16.msra.mxu1 %v729_v27 }
  0x1e   :  { %658 = vmatprep.subr.bf16.mxu1 %v732_v30 }
  0x1f   :  { %631 = vmatpush3.bf16.msra.mxu0 %v731_v29 }
  0x20   :  { %682 = vmatprep.subr.bf16.mxu0 %v737_v34 }
  0x21   :  { %659 = vmatpush3.bf16.msra.mxu1 %v736_v33 }
  0x22   :  { %439 = vmatmul.mubr.bf16.vlgmr.msra.gmra.mxu0 %v733_v31 }
  0x23   :  { %683 = vmatpush3.bf16.msra.mxu0 %v737_v34  ;;  %446 = vmatprep.mubr.bf16.mxu0 %v745_v40 }
  0x24   :  { %488 = vmatmul.mubr.bf16.vlgmr.msra.gmra.mxu1 %v738_v35  ;;  %684 = vmatprep.subr.bf16.mxu0 %v741_v37 }
  0x25   :  { %495 = vmatprep.mubr.bf16.mxu1 %v748_v42 }
  0x27   :  { %685 = vmatpush3.bf16.msra.mxu0 %v741_v37 }
  0x28   :  { %686 = vmatprep.subr.bf16.mxu0 %v742_v38 }
  0x2a   :  { %447 = vmatmul.mubr.bf16.gmra.mxu0 %v747_v41 }
  0x2b   :  { %687 = vmatpush3.bf16.msra.mxu0 %v742_v38  ;;  %698 = vmatprep.mubr.bf16.mxu0 %v754_v45 }
  0x2c   :  { %688 = vmatprep.subr.bf16.mxu0 %v743_v39  ;;  %496 = vmatmul.mubr.bf16.gmra.mxu1 %v750_v43 }
  0x2f   :  { %689 = vmatpush3.bf16.msra.mxu0 %v743_v39 }
  0x30   :  { %690 = vmatprep.subr.bf16.mxu0 %v744_v44 }
  0x33   :  { %691 = vmatpush3.bf16.msra.mxu0 %v744_v44 }
  0x34   :  { %692 = vmatprep.subr.bf16.mxu0 %v751_v46 }
  0x37   :  { %693 = vmatpush3.bf16.msra.mxu0 %v751_v46 }
  0x38   :  { %694 = vmatprep.subr.bf16.mxu0 %v752_v47 }
  0x3b   :  { %695 = vmatpush3.bf16.msra.mxu0 %v752_v47 }
  0x3c   :  { %696 = vmatprep.subr.bf16.mxu0 %v753_v48 }
  0x3f   :  { %697 = vmatpush3.bf16.msra.mxu0 %v753_v48 }
  0x42   :  { %699 = vmatmul.mubr.bf16.vlgmr.msra.gmra.mxu0 %v755_v49 }
  0xe2   :  { %v632_v50 = vpop.f32.mrf.mxu0 }
  0xe4   :  { %v633_v51 = vpop.f32.mrf.mxu0  ;;  %v660_v52 = vpop.f32.mrf.mxu1 }
  0xe5   :  { %v634_v2 = vadd.f32 %v633_v51, %v632_v50 }
  0xe6   :  { %v635_v53 = vpop.f32.mrf.mxu0  ;;  %v661_v54 = vpop.f32.mrf.mxu1 }
  0xe7   :  { %v441_v8 = vadd.f32 %v634_v2, %v565_v3  ;;  %v662_v9 = vadd.f32 %v661_v54, %v660_v52 }
  0xe8   :  { %v636_v55 = vpop.f32.mrf.mxu0  ;;  %v663_v56 = vpop.f32.mrf.mxu1 }
  0xe9   :  { %v637_v10 = vadd.f32 %v636_v55, %v635_v53  ;;  %v490_v18 = vadd.f32 %v662_v9, %v441_v8 }
  0xea   :  { %v638_v57 = vpop.f32.mrf.mxu0  ;;  %v664_v58 = vpop.f32.mrf.mxu1 }
  0xeb   :  { %v444_v15 = vadd.f32 %v637_v10, %v565_v3  ;;  %v665_v16 = vadd.f32 %v664_v58, %v663_v56 }
  0xec   :  { %v639_v59 = vpop.f32.mrf.mxu0  ;;  %v666_v60 = vpop.f32.mrf.mxu1 }
  0xed   :  { %v640_v63 = vadd.f32 %v639_v59, %v638_v57  ;;  %v493_v26 = vadd.f32 %v665_v16, %v444_v15 }
  0xee   :  { %v641_v61 = vpop.f32.mrf.mxu0  ;;  %v667_v62 = vpop.f32.mrf.mxu1 }
  0xef   :  { %v449_v4 = vadd.f32 %v640_v63, %v565_v3  ;;  %v668_v5 = vadd.f32 %v667_v62, %v666_v60 }
  0xf0   :  { %v642_v0 = vpop.f32.mrf.mxu0  ;;  %v669_v1 = vpop.f32.mrf.mxu1 }
  0xf1   :  { %v643_v6 = vadd.f32 %v642_v0, %v641_v61  ;;  %v498_v13 = vadd.f32 %v668_v5, %v449_v4 }
  0xf2   :  { %v670_v7 = vpop.f32.mrf.mxu1 }
  0xf3   :  { %v452_v11 = vadd.f32 %v643_v6, %v565_v3  ;;  %v671_v12 = vadd.f32 %v670_v7, %v669_v1 }
  0xf5   :  { %v501_v22 = vadd.f32 %v671_v12, %v452_v11 }
 0x102   :  { %v700_v14 = vpop.f32.mrf.mxu0 }
 0x103   :  { %v547_v17 = vadd.f32 %v700_v14, %v498_v13 }
 0x104   :  { %v538_v19 = vpop.f32.mrf.mxu0 }
 0x105   :  { %v555_v20 = vmax.f32 %v547_v17, 0.0  ;;  %v539_v21 = vadd.f32 %v538_v19, %v490_v18 }
 0x106   :  { %v701_v23 = vpop.f32.mrf.mxu0 }
 0x107   :  { %559 = vst [vmem:[%s944_s3 + $0x10] sm:$0xff] %v555_v20  ;;  %v553_v24 = vmax.f32 %v539_v21, 0.0  ;;  %v550_v25 = vadd.f32 %v701_v23, %v501_v22 }
 0x108   :  { %v541_v27 = vpop.f32.mrf.mxu0 }
 0x109   :  { %557 = vst [vmem:[%s944_s3] sm:$0xff] %v553_v24  ;;  %v556_v28 = vmax.f32 %v550_v25, 0.0  ;;  %v542_v29 = vadd.f32 %v541_v27, %v493_v26 }
 0x10b   :  { %560 = vst [vmem:[%s944_s3 + $0x18] sm:$0xff] %v556_v28  ;;  %v554_v30 = vmax.f32 %v542_v29, 0.0 }
 0x10d   :  { %558 = vst [vmem:[%s944_s3 + $0x8] sm:$0xff] %v554_v30 }

// kernel: dqn_forward.7
= control target key start
LH: loop header
LB: loop body
LE: loop exit
PB: predicated region body
PF: predicated region fallthrough
CT: control target
= control target key end

     0   :  { %v281_v36 = vlaneseq  ;;  %v3107_v37 = vmov 1966171168   ;;  %s4071_s0 = inlined_call_operand.vmem [shape: bf16[2,1024], index: 0, kind: input, shape index: {}]   ;;  %s4072_s1 = inlined_call_operand.vmem [shape: bf16[1024,512], index: 1, kind: input, shape index: {}]   ;;  %s4073_s2 = inlined_call_operand.vmem [shape: f32[1,512], index: 2, kind: input, shape index: {}]   ;;  %s4074_s3 = inlined_call_operand.vmem [shape: bf16[512,128], index: 3, kind: input, shape index: {}]   ;;  %s4075_s4 = inlined_call_operand.vmem [shape: f32[1,128], index: 4, kind: input, shape index: {}]   ;;  %s4076_s5 = inlined_call_operand.hbm [shape: f32[2,128], index: 5, kind: output, shape index: {}]  }
   0x1   :  { %v2668_v0 = vld [vmem:[%s4072_s1 + $0xe4] ss:$16 sps:$4 sm:$0xff]   ;;  %v2672_v2 = vld [vmem:[%s4072_s1 + $0xe0] ss:$16 sps:$4 sm:$0xff]   ;;  %v304_v38 = vunpack.c.l.s4 %v3107_v37 }
   0x2   :  { %v2670_v1 = vld [vmem:[%s4072_s1 + $0x2e4] ss:$16 sps:$4 sm:$0xff]   ;;  %1639 = vmatprep.subr.bf16.mxu0 %v2668_v0  ;;  %v2673_v3 = vld [vmem:[%s4072_s1 + $0x2e0] ss:$16 sps:$4 sm:$0xff]   ;;  %v3256_v42 = vshrl.u32 %v281_v36, 7 }
   0x3   :  { %1680 = vmatprep.subr.bf16.mxu1 %v2670_v1  ;;  %v2674_v4 = vld [vmem:[%s4072_s1 + $0xc4] ss:$16 sps:$4 sm:$0xff]   ;;  %1640 = vmatpush1.bf16.msra.mxu0 %v2672_v2  ;;  %v2678_v6 = vld [vmem:[%s4072_s1 + $0xc0] ss:$16 sps:$4 sm:$0xff]   ;;  %v305_v43 = vunpack.c.0.s8 %v304_v38 }
   0x4   :  { %1681 = vmatpush1.bf16.msra.mxu1 %v2673_v3  ;;  %v2676_v5 = vld [vmem:[%s4072_s1 + $0x2c4] ss:$16 sps:$4 sm:$0xff]   ;;  %1641 = vmatprep.subr.bf16.mxu0 %v2674_v4  ;;  %v2679_v7 = vld [vmem:[%s4072_s1 + $0x2c0] ss:$16 sps:$4 sm:$0xff]  }
   0x5   :  { %1682 = vmatprep.subr.bf16.mxu1 %v2676_v5  ;;  %v2680_v8 = vld [vmem:[%s4072_s1 + $0xa4] ss:$16 sps:$4 sm:$0xff]   ;;  %v2684_v10 = vld [vmem:[%s4072_s1 + $0xa0] ss:$16 sps:$4 sm:$0xff]   ;;  %v308_v49 = vsub.s32 %v305_v43, %v3256_v42 }
   0x6   :  { %v2682_v9 = vld [vmem:[%s4072_s1 + $0x2a4] ss:$16 sps:$4 sm:$0xff]   ;;  %v2685_v11 = vld [vmem:[%s4072_s1 + $0x2a0] ss:$16 sps:$4 sm:$0xff]  }
   0x7   :  { %1642 = vmatpush1.bf16.msra.mxu0 %v2678_v6  ;;  %v2686_v12 = vld [vmem:[%s4072_s1 + $0x84] ss:$16 sps:$4 sm:$0xff]   ;;  %v2690_v14 = vld [vmem:[%s4072_s1 + $0x80] ss:$16 sps:$4 sm:$0xff]  }
   0x8   :  { %1683 = vmatpush1.bf16.msra.mxu1 %v2679_v7  ;;  %1643 = vmatprep.subr.bf16.mxu0 %v2680_v8  ;;  %v2688_v13 = vld [vmem:[%s4072_s1 + $0x284] ss:$16 sps:$4 sm:$0xff]   ;;  %v2691_v15 = vld [vmem:[%s4072_s1 + $0x280] ss:$16 sps:$4 sm:$0xff]  }
   0x9   :  { %1684 = vmatprep.subr.bf16.mxu1 %v2682_v9  ;;  %v2692_v16 = vld [vmem:[%s4072_s1 + $0x64] ss:$16 sps:$4 sm:$0xff]   ;;  %v2696_v18 = vld [vmem:[%s4072_s1 + $0x60] ss:$16 sps:$4 sm:$0xff]  }
   0xa   :  { %v2694_v17 = vld [vmem:[%s4072_s1 + $0x264] ss:$16 sps:$4 sm:$0xff]   ;;  %v2697_v19 = vld [vmem:[%s4072_s1 + $0x260] ss:$16 sps:$4 sm:$0xff]  }
   0xb   :  { %1644 = vmatpush1.bf16.msra.mxu0 %v2684_v10  ;;  %v2698_v20 = vld [vmem:[%s4072_s1 + $0x44] ss:$16 sps:$4 sm:$0xff]   ;;  %v2702_v22 = vld [vmem:[%s4072_s1 + $0x40] ss:$16 sps:$4 sm:$0xff]  }
   0xc   :  { %1685 = vmatpush1.bf16.msra.mxu1 %v2685_v11  ;;  %1645 = vmatprep.subr.bf16.mxu0 %v2686_v12  ;;  %v2700_v21 = vld [vmem:[%s4072_s1 + $0x244] ss:$16 sps:$4 sm:$0xff]   ;;  %v2703_v23 = vld [vmem:[%s4072_s1 + $0x240] ss:$16 sps:$4 sm:$0xff]  }
   0xd   :  { %1686 = vmatprep.subr.bf16.mxu1 %v2688_v13  ;;  %v2704_v24 = vld [vmem:[%s4072_s1 + $0x24] ss:$16 sps:$4 sm:$0xff]   ;;  %v2708_v26 = vld [vmem:[%s4072_s1 + $0x20] ss:$16 sps:$4 sm:$0xff]  }
   0xe   :  { %v2706_v25 = vld [vmem:[%s4072_s1 + $0x224] ss:$16 sps:$4 sm:$0xff]   ;;  %v2709_v27 = vld [vmem:[%s4072_s1 + $0x220] ss:$16 sps:$4 sm:$0xff]  }
   0xf   :  { %1646 = vmatpush1.bf16.msra.mxu0 %v2690_v14  ;;  %v2710_v28 = vld [vmem:[%s4072_s1 + $0x4] ss:$16 sps:$4 sm:$0xff]   ;;  %v2714_v30 = vld [vmem:[%s4072_s1] ss:$16 sps:$4 sm:$0xff]  }
  0x10   :  { %1687 = vmatpush1.bf16.msra.mxu1 %v2691_v15  ;;  %1647 = vmatprep.subr.bf16.mxu0 %v2692_v16  ;;  %v2712_v29 = vld [vmem:[%s4072_s1 + $0x204] ss:$16 sps:$4 sm:$0xff]   ;;  %v2715_v31 = vld [vmem:[%s4072_s1 + $0x200] ss:$16 sps:$4 sm:$0xff]  }
  0x11   :  { %1688 = vmatprep.subr.bf16.mxu1 %v2694_v17  ;;  %v2716_v32 = vld [vmem:[%s4072_s1 + $0x1e4] ss:$16 sps:$4 sm:$0xff]   ;;  %v2720_v34 = vld [vmem:[%s4072_s1 + $0x1e0] ss:$16 sps:$4 sm:$0xff]  }
  0x12   :  { %v2718_v33 = vld [vmem:[%s4072_s1 + $0x3e4] ss:$16 sps:$4 sm:$0xff]   ;;  %v2721_v35 = vld [vmem:[%s4072_s1 + $0x3e0] ss:$16 sps:$4 sm:$0xff]  }
  0x13   :  { %1648 = vmatpush1.bf16.msra.mxu0 %v2696_v18  ;;  %v2722_v39 = vld [vmem:[%s4072_s1 + $0x1c4] ss:$16 sps:$4 sm:$0xff]   ;;  %v2726_v41 = vld [vmem:[%s4072_s1 + $0x1c0] ss:$16 sps:$4 sm:$0xff]  }
  0x14   :  { %1689 = vmatpush1.bf16.msra.mxu1 %v2697_v19  ;;  %1649 = vmatprep.subr.bf16.mxu0 %v2698_v20  ;;  %v2724_v40 = vld [vmem:[%s4072_s1 + $0x3c4] ss:$16 sps:$4 sm:$0xff]   ;;  %v2727_v44 = vld [vmem:[%s4072_s1 + $0x3c0] ss:$16 sps:$4 sm:$0xff]  }
  0x15   :  { %1690 = vmatprep.subr.bf16.mxu1 %v2700_v21  ;;  %v2728_v45 = vld [vmem:[%s4072_s1 + $0x1a4] ss:$16 sps:$4 sm:$0xff]   ;;  %v2732_v47 = vld [vmem:[%s4072_s1 + $0x1a0] ss:$16 sps:$4 sm:$0xff]  }
  0x16   :  { %v2730_v46 = vld [vmem:[%s4072_s1 + $0x3a4] ss:$16 sps:$4 sm:$0xff]   ;;  %v2733_v48 = vld [vmem:[%s4072_s1 + $0x3a0] ss:$16 sps:$4 sm:$0xff]  }
  0x17   :  { %1650 = vmatpush1.bf16.msra.mxu0 %v2702_v22  ;;  %v2734_v50 = vld [vmem:[%s4072_s1 + $0x184] ss:$16 sps:$4 sm:$0xff]   ;;  %v2738_v53 = vld [vmem:[%s4072_s1 + $0x180] ss:$16 sps:$4 sm:$0xff]  }
  0x18   :  { %1691 = vmatpush1.bf16.msra.mxu1 %v2703_v23  ;;  %1651 = vmatprep.subr.bf16.mxu0 %v2704_v24  ;;  %v2736_v51 = vld [vmem:[%s4072_s1 + $0x384] ss:$16 sps:$4 sm:$0xff]   ;;  %v2739_v56 = vld [vmem:[%s4072_s1 + $0x380] ss:$16 sps:$4 sm:$0xff]  }
  0x19   :  { %1692 = vmatprep.subr.bf16.mxu1 %v2706_v25  ;;  %v22_v52 = vld [vmem:[%s4071_s0] sm:$0xff] }
  0x1a   :  { %v309_v54 = vrot.slane %v22_v52, %v308_v49  ;;  %v302_v55 = vcombine.high %v22_v52, %v22_v52  ;;  %v2740_v57 = vld [vmem:[%s4072_s1 + $0x164] ss:$16 sps:$4 sm:$0xff]   ;;  %v2744_v61 = vld [vmem:[%s4072_s1 + $0x160] ss:$16 sps:$4 sm:$0xff]  }
  0x1b   :  { %1652 = vmatpush1.bf16.msra.mxu0 %v2708_v26  ;;  %v2742_v58 = vld [vmem:[%s4072_s1 + $0x364] ss:$16 sps:$4 sm:$0xff]   ;;  %v2745_v0 = vld [vmem:[%s4072_s1 + $0x360] ss:$16 sps:$4 sm:$0xff]  }
  0x1c   :  { %1693 = vmatpush1.bf16.msra.mxu1 %v2709_v27  ;;  %1653 = vmatprep.subr.bf16.mxu0 %v2710_v28  ;;  %v317_v59 = vcombine.high %v309_v54, %v309_v54  ;;  %v316_v60 = vrot.slane %v302_v55, %v308_v49  ;;  %v2746_v1 = vld [vmem:[%s4072_s1 + $0x144] ss:$16 sps:$4 sm:$0xff]   ;;  %v2750_v4 = vld [vmem:[%s4072_s1 + $0x140] ss:$16 sps:$4 sm:$0xff]   ;;  %v3344_v14 = vrot.slane %v309_v54, %v308_v49 }
  0x1d   :  { %1694 = vmatprep.subr.bf16.mxu1 %v2712_v29  ;;  %v2748_v2 = vld [vmem:[%s4072_s1 + $0x344] ss:$16 sps:$4 sm:$0xff]   ;;  %v2751_v5 = vld [vmem:[%s4072_s1 + $0x340] ss:$16 sps:$4 sm:$0xff]  }
  0x1e   :  { %v3298_v62 = vrot.slane %v317_v59, %v308_v49  ;;  %v3300_v63 = vrot.slane %v316_v60, %v308_v49  ;;  %v2752_v6 = vld [vmem:[%s4072_s1 + $0x124] ss:$16 sps:$4 sm:$0xff]   ;;  %v2756_v8 = vld [vmem:[%s4072_s1 + $0x120] ss:$16 sps:$4 sm:$0xff]   ;;  %v318_v12 = vcombine.high %v316_v60, %v316_v60  ;;  %v3359_v19 = vcombine.high %v3344_v14, %v3344_v14 }
  0x1f   :  { %1654 = vmatpush1.bf16.msra.mxu0 %v2714_v30  ;;  %v2754_v7 = vld [vmem:[%s4072_s1 + $0x324] ss:$16 sps:$4 sm:$0xff]   ;;  %v2757_v9 = vld [vmem:[%s4072_s1 + $0x320] ss:$16 sps:$4 sm:$0xff]  }
  0x20   :  { %1695 = vmatpush1.bf16.msra.mxu1 %v2715_v31  ;;  %1655 = vmatprep.subr.bf16.mxu0 %v2716_v32  ;;  %v3313_v3 = vcombine.high %v3298_v62, %v3298_v62  ;;  %v2758_v10 = vld [vmem:[%s4072_s1 + $0x104] ss:$16 sps:$4 sm:$0xff]   ;;  %v2762_v13 = vld [vmem:[%s4072_s1 + $0x100] ss:$16 sps:$4 sm:$0xff]   ;;  %v3355_v18 = vrot.slane %v318_v12, %v308_v49 }
  0x21   :  { %1696 = vmatprep.subr.bf16.mxu1 %v2718_v33  ;;  %1671 = vmatprep.mubr.bf16.mxu0 %v3298_v62  ;;  %v2760_v11 = vld [vmem:[%s4072_s1 + $0x304] ss:$16 sps:$4 sm:$0xff]   ;;  %v2763_v15 = vld [vmem:[%s4072_s1 + $0x300] ss:$16 sps:$4 sm:$0xff]  }
  0x22   :  { %1712 = vmatprep.mubr.bf16.mxu1 %v3313_v3  ;;  %v2766_v16 = vld [vmem:[%s4072_s1 + $0x4e4] ss:$16 sps:$4 sm:$0xff]   ;;  %v2764_v20 = vld [vmem:[%s4072_s1 + $0x4e0] ss:$16 sps:$4 sm:$0xff]   ;;  %v3375_v24 = vcombine.high %v3355_v18, %v3355_v18 }
  0x23   :  { %1656 = vmatpush2.bf16.msra.mxu0 %v2720_v34  ;;  %v2769_v17 = vld [vmem:[%s4072_s1 + $0x6e4] ss:$16 sps:$4 sm:$0xff]   ;;  %v2767_v21 = vld [vmem:[%s4072_s1 + $0x6e0] ss:$16 sps:$4 sm:$0xff]  }
  0x24   :  { %1697 = vmatpush2.bf16.msra.mxu1 %v2721_v35  ;;  %1657 = vmatprep.subr.bf16.mxu0 %v2722_v39  ;;  %v2772_v22 = vld [vmem:[%s4072_s1 + $0x4c4] ss:$16 sps:$4 sm:$0xff]   ;;  %v2770_v25 = vld [vmem:[%s4072_s1 + $0x4c0] ss:$16 sps:$4 sm:$0xff]  }
  0x25   :  { %1698 = vmatprep.subr.bf16.mxu1 %v2724_v40  ;;  %v2775_v23 = vld [vmem:[%s4072_s1 + $0x6c4] ss:$16 sps:$4 sm:$0xff]   ;;  %v2773_v26 = vld [vmem:[%s4072_s1 + $0x6c0] ss:$16 sps:$4 sm:$0xff]  }
  0x26   :  { %v2778_v27 = vld [vmem:[%s4072_s1 + $0x4a4] ss:$16 sps:$4 sm:$0xff]   ;;  %v2776_v29 = vld [vmem:[%s4072_s1 + $0x4a0] ss:$16 sps:$4 sm:$0xff]  }
  0x27   :  { %1658 = vmatpush2.bf16.msra.mxu0 %v2726_v41  ;;  %v2781_v28 = vld [vmem:[%s4072_s1 + $0x6a4] ss:$16 sps:$4 sm:$0xff]   ;;  %v2779_v30 = vld [vmem:[%s4072_s1 + $0x6a0] ss:$16 sps:$4 sm:$0xff]  }
  0x28   :  { %1699 = vmatpush2.bf16.msra.mxu1 %v2727_v44  ;;  %1659 = vmatprep.subr.bf16.mxu0 %v2728_v45  ;;  %v2784_v31 = vld [vmem:[%s4072_s1 + $0x484] ss:$16 sps:$4 sm:$0xff]   ;;  %v2782_v33 = vld [vmem:[%s4072_s1 + $0x480] ss:$16 sps:$4 sm:$0xff]  }
  0x29   :  { %1700 = vmatprep.subr.bf16.mxu1 %v2730_v46  ;;  %v2787_v32 = vld [vmem:[%s4072_s1 + $0x684] ss:$16 sps:$4 sm:$0xff]   ;;  %v2785_v34 = vld [vmem:[%s4072_s1 + $0x680] ss:$16 sps:$4 sm:$0xff]  }
  0x2a   :  { %v2790_v35 = vld [vmem:[%s4072_s1 + $0x464] ss:$16 sps:$4 sm:$0xff]   ;;  %v2788_v37 = vld [vmem:[%s4072_s1 + $0x460] ss:$16 sps:$4 sm:$0xff]  }
  0x2b   :  { %1660 = vmatpush2.bf16.msra.mxu0 %v2732_v47  ;;  %v2793_v36 = vld [vmem:[%s4072_s1 + $0x664] ss:$16 sps:$4 sm:$0xff]   ;;  %v2791_v38 = vld [vmem:[%s4072_s1 + $0x660] ss:$16 sps:$4 sm:$0xff]  }
  0x2c   :  { %1701 = vmatpush2.bf16.msra.mxu1 %v2733_v48  ;;  %1661 = vmatprep.subr.bf16.mxu0 %v2734_v50  ;;  %v2796_v39 = vld [vmem:[%s4072_s1 + $0x444] ss:$16 sps:$4 sm:$0xff]   ;;  %v2794_v41 = vld [vmem:[%s4072_s1 + $0x440] ss:$16 sps:$4 sm:$0xff]  }
  0x2d   :  { %1702 = vmatprep.subr.bf16.mxu1 %v2736_v51  ;;  %v2799_v40 = vld [vmem:[%s4072_s1 + $0x644] ss:$16 sps:$4 sm:$0xff]   ;;  %v2797_v43 = vld [vmem:[%s4072_s1 + $0x640] ss:$16 sps:$4 sm:$0xff]  }
  0x2e   :  { %v2802_v44 = vld [vmem:[%s4072_s1 + $0x424] ss:$16 sps:$4 sm:$0xff]   ;;  %v2800_v46 = vld [vmem:[%s4072_s1 + $0x420] ss:$16 sps:$4 sm:$0xff]  }
  0x2f   :  { %1662 = vmatpush2.bf16.msra.mxu0 %v2738_v53  ;;  %v2805_v45 = vld [vmem:[%s4072_s1 + $0x624] ss:$16 sps:$4 sm:$0xff]   ;;  %v2803_v47 = vld [vmem:[%s4072_s1 + $0x620] ss:$16 sps:$4 sm:$0xff]  }
  0x30   :  { %1703 = vmatpush2.bf16.msra.mxu1 %v2739_v56  ;;  %1663 = vmatprep.subr.bf16.mxu0 %v2740_v57  ;;  %v2808_v48 = vld [vmem:[%s4072_s1 + $0x404] ss:$16 sps:$4 sm:$0xff]   ;;  %v2806_v50 = vld [vmem:[%s4072_s1 + $0x400] ss:$16 sps:$4 sm:$0xff]  }
  0x31   :  { %1704 = vmatprep.subr.bf16.mxu1 %v2742_v58  ;;  %v2811_v49 = vld [vmem:[%s4072_s1 + $0x604] ss:$16 sps:$4 sm:$0xff]   ;;  %v2809_v51 = vld [vmem:[%s4072_s1 + $0x600] ss:$16 sps:$4 sm:$0xff]  }
  0x32   :  { %v2814_v52 = vld [vmem:[%s4072_s1 + $0x5e4] ss:$16 sps:$4 sm:$0xff]   ;;  %v2812_v54 = vld [vmem:[%s4072_s1 + $0x5e0] ss:$16 sps:$4 sm:$0xff]  }
  0x33   :  { %1664 = vmatpush2.bf16.msra.mxu0 %v2744_v61  ;;  %v2817_v53 = vld [vmem:[%s4072_s1 + $0x7e4] ss:$16 sps:$4 sm:$0xff]   ;;  %v2815_v55 = vld [vmem:[%s4072_s1 + $0x7e0] ss:$16 sps:$4 sm:$0xff]  }
  0x34   :  { %1705 = vmatpush2.bf16.msra.mxu1 %v2745_v0  ;;  %1665 = vmatprep.subr.bf16.mxu0 %v2746_v1  ;;  %v2820_v56 = vld [vmem:[%s4072_s1 + $0x5c4] ss:$16 sps:$4 sm:$0xff]   ;;  %v2818_v58 = vld [vmem:[%s4072_s1 + $0x5c0] ss:$16 sps:$4 sm:$0xff]  }
  0x35   :  { %1706 = vmatprep.subr.bf16.mxu1 %v2748_v2  ;;  %v2823_v57 = vld [vmem:[%s4072_s1 + $0x7c4] ss:$16 sps:$4 sm:$0xff]   ;;  %v2821_v59 = vld [vmem:[%s4072_s1 + $0x7c0] ss:$16 sps:$4 sm:$0xff]  }
  0x36   :  { %v2826_v60 = vld [vmem:[%s4072_s1 + $0x5a4] ss:$16 sps:$4 sm:$0xff]   ;;  %v2824_v0 = vld [vmem:[%s4072_s1 + $0x5a0] ss:$16 sps:$4 sm:$0xff]  }
  0x37   :  { %1666 = vmatpush2.bf16.msra.mxu0 %v2750_v4  ;;  %v2829_v61 = vld [vmem:[%s4072_s1 + $0x7a4] ss:$16 sps:$4 sm:$0xff]   ;;  %v2827_v1 = vld [vmem:[%s4072_s1 + $0x7a0] ss:$16 sps:$4 sm:$0xff]  }
  0x38   :  { %1707 = vmatpush2.bf16.msra.mxu1 %v2751_v5  ;;  %1667 = vmatprep.subr.bf16.mxu0 %v2752_v6  ;;  %v2832_v2 = vld [vmem:[%s4072_s1 + $0x584] ss:$16 sps:$4 sm:$0xff]   ;;  %v2830_v5 = vld [vmem:[%s4072_s1 + $0x580] ss:$16 sps:$4 sm:$0xff]  }
  0x39   :  { %1708 = vmatprep.subr.bf16.mxu1 %v2754_v7  ;;  %v2835_v4 = vld [vmem:[%s4072_s1 + $0x784] ss:$16 sps:$4 sm:$0xff]   ;;  %v2833_v6 = vld [vmem:[%s4072_s1 + $0x780] ss:$16 sps:$4 sm:$0xff]  }
  0x3a   :  { %v2838_v7 = vld [vmem:[%s4072_s1 + $0x564] ss:$16 sps:$4 sm:$0xff]  }
  0x3b   :  { %1668 = vmatpush2.bf16.msra.mxu0 %v2756_v8  ;;  %v2841_v8 = vld [vmem:[%s4072_s1 + $0x764] ss:$16 sps:$4 sm:$0xff]  }
  0x3c   :  { %1709 = vmatpush2.bf16.msra.mxu1 %v2757_v9  ;;  %1669 = vmatprep.subr.bf16.mxu0 %v2758_v10  ;;  %v2836_v9 = vld [vmem:[%s4072_s1 + $0x560] ss:$16 sps:$4 sm:$0xff]   ;;  %v2847_v12 = vld [vmem:[%s4072_s1 + $0x744] ss:$16 sps:$4 sm:$0xff]  }
  0x3d   :  { %1710 = vmatprep.subr.bf16.mxu1 %v2760_v11  ;;  %v2839_v10 = vld [vmem:[%s4072_s1 + $0x760] ss:$16 sps:$4 sm:$0xff]   ;;  %v2844_v11 = vld [vmem:[%s4072_s1 + $0x544] ss:$16 sps:$4 sm:$0xff]  }
  0x3f   :  { %1670 = vmatpush2.bf16.msra.mxu0 %v2762_v13  ;;  %v2842_v13 = vld [vmem:[%s4072_s1 + $0x540] ss:$16 sps:$4 sm:$0xff]  }
  0x40   :  { %1711 = vmatpush2.bf16.msra.mxu1 %v2763_v15  ;;  %1721 = vmatprep.subr.bf16.mxu0 %v2766_v16  ;;  %v2845_v15 = vld [vmem:[%s4072_s1 + $0x740] ss:$16 sps:$4 sm:$0xff]   ;;  %v2850_v16 = vld [vmem:[%s4072_s1 + $0x524] ss:$16 sps:$4 sm:$0xff]  }
  0x41   :  { %1762 = vmatprep.subr.bf16.mxu1 %v2769_v17  ;;  %v2853_v17 = vld [vmem:[%s4072_s1 + $0x724] ss:$16 sps:$4 sm:$0xff]  }
  0x42   :  { %1672 = vmatmul.mubr.bf16.vlgmr.msra.gmra.mxu0 %v3344_v14 }
  0x43   :  { %1713 = vmatmul.mubr.bf16.vlgmr.msra.gmra.mxu1 %v3359_v19  ;;  %1722 = vmatpush1.bf16.msra.mxu0 %v2764_v20  ;;  %v2848_v20 = vld [vmem:[%s4072_s1 + $0x520] ss:$16 sps:$4 sm:$0xff]  }
  0x44   :  { %1763 = vmatpush1.bf16.msra.mxu1 %v2767_v21  ;;  %1723 = vmatprep.subr.bf16.mxu0 %v2772_v22  ;;  %v2851_v21 = vld [vmem:[%s4072_s1 + $0x720] ss:$16 sps:$4 sm:$0xff]   ;;  %v2856_v22 = vld [vmem:[%s4072_s1 + $0x504] ss:$16 sps:$4 sm:$0xff]  }
  0x45   :  { %1764 = vmatprep.subr.bf16.mxu1 %v2775_v23  ;;  %1753 = vmatprep.mubr.bf16.mxu0 %v3355_v18  ;;  %v2859_v23 = vld [vmem:[%s4072_s1 + $0x704] ss:$16 sps:$4 sm:$0xff]  }
  0x46   :  { %1794 = vmatprep.mubr.bf16.mxu1 %v3375_v24 }
  0x47   :  { %1724 = vmatpush1.bf16.msra.mxu0 %v2770_v25  ;;  %v2854_v25 = vld [vmem:[%s4072_s1 + $0x500] ss:$16 sps:$4 sm:$0xff]  }
  0x48   :  { %1765 = vmatpush1.bf16.msra.mxu1 %v2773_v26  ;;  %1725 = vmatprep.subr.bf16.mxu0 %v2778_v27  ;;  %v2857_v26 = vld [vmem:[%s4072_s1 + $0x700] ss:$16 sps:$4 sm:$0xff]   ;;  %v2863_v27 = vld [vmem:[%s4072_s1 + $0xec] ss:$16 sps:$4 sm:$0xff]  }
  0x49   :  { %1766 = vmatprep.subr.bf16.mxu1 %v2781_v28  ;;  %v2866_v28 = vld [vmem:[%s4072_s1 + $0x2ec] ss:$16 sps:$4 sm:$0xff]  }
  0x4b   :  { %1726 = vmatpush1.bf16.msra.mxu0 %v2776_v29  ;;  %v3563_v29 = vcombine.high %v3300_v63, %v3300_v63 }
  0x4c   :  { %1767 = vmatpush1.bf16.msra.mxu1 %v2779_v30  ;;  %1727 = vmatprep.subr.bf16.mxu0 %v2784_v31  ;;  %v2861_v30 = vld [vmem:[%s4072_s1 + $0xe8] ss:$16 sps:$4 sm:$0xff]  }
  0x4d   :  { %1768 = vmatprep.subr.bf16.mxu1 %v2787_v32  ;;  %v2864_v31 = vld [vmem:[%s4072_s1 + $0x2e8] ss:$16 sps:$4 sm:$0xff]   ;;  %v2869_v32 = vld [vmem:[%s4072_s1 + $0xcc] ss:$16 sps:$4 sm:$0xff]  }
  0x4f   :  { %1728 = vmatpush1.bf16.msra.mxu0 %v2782_v33  ;;  %v2872_v33 = vld [vmem:[%s4072_s1 + $0x2cc] ss:$16 sps:$4 sm:$0xff]  }
  0x50   :  { %1769 = vmatpush1.bf16.msra.mxu1 %v2785_v34  ;;  %1729 = vmatprep.subr.bf16.mxu0 %v2790_v35  ;;  %v2867_v34 = vld [vmem:[%s4072_s1 + $0xc8] ss:$16 sps:$4 sm:$0xff]  }
  0x51   :  { %1770 = vmatprep.subr.bf16.mxu1 %v2793_v36  ;;  %v2870_v35 = vld [vmem:[%s4072_s1 + $0x2c8] ss:$16 sps:$4 sm:$0xff]   ;;  %v2875_v36 = vld [vmem:[%s4072_s1 + $0xac] ss:$16 sps:$4 sm:$0xff]  }
  0x53   :  { %1730 = vmatpush1.bf16.msra.mxu0 %v2788_v37  ;;  %v2878_v37 = vld [vmem:[%s4072_s1 + $0x2ac] ss:$16 sps:$4 sm:$0xff]  }
  0x54   :  { %1771 = vmatpush1.bf16.msra.mxu1 %v2791_v38  ;;  %1731 = vmatprep.subr.bf16.mxu0 %v2796_v39  ;;  %v2873_v38 = vld [vmem:[%s4072_s1 + $0xa8] ss:$16 sps:$4 sm:$0xff]  }
  0x55   :  { %1772 = vmatprep.subr.bf16.mxu1 %v2799_v40  ;;  %v2876_v39 = vld [vmem:[%s4072_s1 + $0x2a8] ss:$16 sps:$4 sm:$0xff]   ;;  %v2881_v40 = vld [vmem:[%s4072_s1 + $0x8c] ss:$16 sps:$4 sm:$0xff]  }
  0x57   :  { %1732 = vmatpush1.bf16.msra.mxu0 %v2794_v41  ;;  %v2882_v41 = vld [vmem:[%s4072_s1 + $0x288] ss:$16 sps:$4 sm:$0xff]  }
  0x58   :  { %1773 = vmatpush1.bf16.msra.mxu1 %v2797_v43  ;;  %1733 = vmatprep.subr.bf16.mxu0 %v2802_v44  ;;  %v2887_v43 = vld [vmem:[%s4072_s1 + $0x6c] ss:$16 sps:$4 sm:$0xff]  }
  0x59   :  { %1774 = vmatprep.subr.bf16.mxu1 %v2805_v45  ;;  %v2890_v44 = vld [vmem:[%s4072_s1 + $0x26c] ss:$16 sps:$4 sm:$0xff]   ;;  %v2885_v45 = vld [vmem:[%s4072_s1 + $0x68] ss:$16 sps:$4 sm:$0xff]  }
  0x5b   :  { %1734 = vmatpush1.bf16.msra.mxu0 %v2800_v46  ;;  %v2888_v46 = vld [vmem:[%s4072_s1 + $0x268] ss:$16 sps:$4 sm:$0xff]  }
  0x5c   :  { %1775 = vmatpush1.bf16.msra.mxu1 %v2803_v47  ;;  %1735 = vmatprep.subr.bf16.mxu0 %v2808_v48  ;;  %v2893_v47 = vld [vmem:[%s4072_s1 + $0x4c] ss:$16 sps:$4 sm:$0xff]  }
  0x5d   :  { %1776 = vmatprep.subr.bf16.mxu1 %v2811_v49  ;;  %v2896_v48 = vld [vmem:[%s4072_s1 + $0x24c] ss:$16 sps:$4 sm:$0xff]   ;;  %v2891_v49 = vld [vmem:[%s4072_s1 + $0x48] ss:$16 sps:$4 sm:$0xff]  }
  0x5f   :  { %1736 = vmatpush1.bf16.msra.mxu0 %v2806_v50  ;;  %v2894_v50 = vld [vmem:[%s4072_s1 + $0x248] ss:$16 sps:$4 sm:$0xff]  }
  0x60   :  { %1777 = vmatpush1.bf16.msra.mxu1 %v2809_v51  ;;  %1737 = vmatprep.subr.bf16.mxu0 %v2814_v52  ;;  %v2899_v51 = vld [vmem:[%s4072_s1 + $0x2c] ss:$16 sps:$4 sm:$0xff]  }
  0x61   :  { %1778 = vmatprep.subr.bf16.mxu1 %v2817_v53  ;;  %v2902_v52 = vld [vmem:[%s4072_s1 + $0x22c] ss:$16 sps:$4 sm:$0xff]   ;;  %v2897_v53 = vld [vmem:[%s4072_s1 + $0x28] ss:$16 sps:$4 sm:$0xff]  }
  0x63   :  { %1738 = vmatpush2.bf16.msra.mxu0 %v2812_v54  ;;  %v2900_v54 = vld [vmem:[%s4072_s1 + $0x228] ss:$16 sps:$4 sm:$0xff]  }
  0x64   :  { %1779 = vmatpush2.bf16.msra.mxu1 %v2815_v55  ;;  %1739 = vmatprep.subr.bf16.mxu0 %v2820_v56  ;;  %v2905_v55 = vld [vmem:[%s4072_s1 + $0xc] ss:$16 sps:$4 sm:$0xff]  }
  0x65   :  { %1780 = vmatprep.subr.bf16.mxu1 %v2823_v57  ;;  %v2908_v56 = vld [vmem:[%s4072_s1 + $0x20c] ss:$16 sps:$4 sm:$0xff]   ;;  %v2903_v57 = vld [vmem:[%s4072_s1 + $0x8] ss:$16 sps:$4 sm:$0xff]  }
  0x67   :  { %1740 = vmatpush2.bf16.msra.mxu0 %v2818_v58  ;;  %v2906_v58 = vld [vmem:[%s4072_s1 + $0x208] ss:$16 sps:$4 sm:$0xff]  }
  0x68   :  { %1781 = vmatpush2.bf16.msra.mxu1 %v2821_v59  ;;  %1741 = vmatprep.subr.bf16.mxu0 %v2826_v60  ;;  %v2911_v59 = vld [vmem:[%s4072_s1 + $0x1ec] ss:$16 sps:$4 sm:$0xff]  }
  0x69   :  { %1782 = vmatprep.subr.bf16.mxu1 %v2829_v61  ;;  %v2914_v60 = vld [vmem:[%s4072_s1 + $0x3ec] ss:$16 sps:$4 sm:$0xff]   ;;  %v2909_v61 = vld [vmem:[%s4072_s1 + $0x1e8] ss:$16 sps:$4 sm:$0xff]  }
  0x6b   :  { %1742 = vmatpush2.bf16.msra.mxu0 %v2824_v0  ;;  %v2912_v0 = vld [vmem:[%s4072_s1 + $0x3e8] ss:$16 sps:$4 sm:$0xff]  }
  0x6c   :  { %1783 = vmatpush2.bf16.msra.mxu1 %v2827_v1  ;;  %1743 = vmatprep.subr.bf16.mxu0 %v2832_v2  ;;  %v2917_v1 = vld [vmem:[%s4072_s1 + $0x1cc] ss:$16 sps:$4 sm:$0xff]  }
  0x6d   :  { %1784 = vmatprep.subr.bf16.mxu1 %v2835_v4  ;;  %v2920_v2 = vld [vmem:[%s4072_s1 + $0x3cc] ss:$16 sps:$4 sm:$0xff]   ;;  %v2915_v4 = vld [vmem:[%s4072_s1 + $0x1c8] ss:$16 sps:$4 sm:$0xff]  }
  0x6f   :  { %1744 = vmatpush2.bf16.msra.mxu0 %v2830_v5  ;;  %v2918_v5 = vld [vmem:[%s4072_s1 + $0x3c8] ss:$16 sps:$4 sm:$0xff]  }
  0x70   :  { %1785 = vmatpush2.bf16.msra.mxu1 %v2833_v6  ;;  %1745 = vmatprep.subr.bf16.mxu0 %v2838_v7  ;;  %v2923_v6 = vld [vmem:[%s4072_s1 + $0x1ac] ss:$16 sps:$4 sm:$0xff]  }
  0x71   :  { %1786 = vmatprep.subr.bf16.mxu1 %v2841_v8  ;;  %v2926_v7 = vld [vmem:[%s4072_s1 + $0x3ac] ss:$16 sps:$4 sm:$0xff]   ;;  %v2921_v8 = vld [vmem:[%s4072_s1 + $0x1a8] ss:$16 sps:$4 sm:$0xff]  }
  0x73   :  { %1746 = vmatpush2.bf16.msra.mxu0 %v2836_v9  ;;  %v2924_v9 = vld [vmem:[%s4072_s1 + $0x3a8] ss:$16 sps:$4 sm:$0xff]  }
  0x74   :  { %1787 = vmatpush2.bf16.msra.mxu1 %v2839_v10  ;;  %1747 = vmatprep.subr.bf16.mxu0 %v2844_v11  ;;  %v2929_v10 = vld [vmem:[%s4072_s1 + $0x18c] ss:$16 sps:$4 sm:$0xff]  }
  0x75   :  { %1788 = vmatprep.subr.bf16.mxu1 %v2847_v12  ;;  %v2932_v11 = vld [vmem:[%s4072_s1 + $0x38c] ss:$16 sps:$4 sm:$0xff]   ;;  %v2927_v12 = vld [vmem:[%s4072_s1 + $0x188] ss:$16 sps:$4 sm:$0xff]  }
  0x77   :  { %1748 = vmatpush2.bf16.msra.mxu0 %v2842_v13  ;;  %v2930_v13 = vld [vmem:[%s4072_s1 + $0x388] ss:$16 sps:$4 sm:$0xff]  }
  0x78   :  { %1789 = vmatpush2.bf16.msra.mxu1 %v2845_v15  ;;  %1749 = vmatprep.subr.bf16.mxu0 %v2850_v16  ;;  %v2935_v15 = vld [vmem:[%s4072_s1 + $0x16c] ss:$16 sps:$4 sm:$0xff]  }
  0x79   :  { %1790 = vmatprep.subr.bf16.mxu1 %v2853_v17  ;;  %v2938_v16 = vld [vmem:[%s4072_s1 + $0x36c] ss:$16 sps:$4 sm:$0xff]   ;;  %v2933_v17 = vld [vmem:[%s4072_s1 + $0x168] ss:$16 sps:$4 sm:$0xff]  }
  0x7b   :  { %1750 = vmatpush2.bf16.msra.mxu0 %v2848_v20  ;;  %v2936_v20 = vld [vmem:[%s4072_s1 + $0x368] ss:$16 sps:$4 sm:$0xff]  }
  0x7c   :  { %1791 = vmatpush2.bf16.msra.mxu1 %v2851_v21  ;;  %1751 = vmatprep.subr.bf16.mxu0 %v2856_v22  ;;  %v2941_v21 = vld [vmem:[%s4072_s1 + $0x14c] ss:$16 sps:$4 sm:$0xff]  }
  0x7d   :  { %1792 = vmatprep.subr.bf16.mxu1 %v2859_v23  ;;  %v2944_v22 = vld [vmem:[%s4072_s1 + $0x34c] ss:$16 sps:$4 sm:$0xff]   ;;  %v2939_v23 = vld [vmem:[%s4072_s1 + $0x148] ss:$16 sps:$4 sm:$0xff]  }
  0x7f   :  { %1752 = vmatpush2.bf16.msra.mxu0 %v2854_v25  ;;  %v2942_v25 = vld [vmem:[%s4072_s1 + $0x348] ss:$16 sps:$4 sm:$0xff]  }
  0x80   :  { %1793 = vmatpush2.bf16.msra.mxu1 %v2857_v26  ;;  %1803 = vmatprep.subr.bf16.mxu0 %v2863_v27  ;;  %v2947_v26 = vld [vmem:[%s4072_s1 + $0x12c] ss:$16 sps:$4 sm:$0xff]  }
  0x81   :  { %1844 = vmatprep.subr.bf16.mxu1 %v2866_v28  ;;  %v2950_v27 = vld [vmem:[%s4072_s1 + $0x32c] ss:$16 sps:$4 sm:$0xff]   ;;  %v2945_v28 = vld [vmem:[%s4072_s1 + $0x128] ss:$16 sps:$4 sm:$0xff]  }
  0x82   :  { %1754 = vmatmul.mubr.bf16.vlgmr.msra.gmra.mxu0 %v3300_v63 }
  0x83   :  { %1795 = vmatmul.mubr.bf16.vlgmr.msra.gmra.mxu1 %v3563_v29  ;;  %1804 = vmatpush1.bf16.msra.mxu0 %v2861_v30  ;;  %v2948_v30 = vld [vmem:[%s4072_s1 + $0x328] ss:$16 sps:$4 sm:$0xff]  }
  0x84   :  { %1845 = vmatpush1.bf16.msra.mxu1 %v2864_v31  ;;  %1805 = vmatprep.subr.bf16.mxu0 %v2869_v32  ;;  %v2953_v31 = vld [vmem:[%s4072_s1 + $0x10c] ss:$16 sps:$4 sm:$0xff]  }
  0x85   :  { %1846 = vmatprep.subr.bf16.mxu1 %v2872_v33  ;;  %1835 = vmatprep.mubr.bf16.mxu0 %v3298_v62  ;;  %v2884_v62 = vld [vmem:[%s4072_s1 + $0x28c] ss:$16 sps:$4 sm:$0xff]   ;;  %v2951_v33 = vld [vmem:[%s4072_s1 + $0x108] ss:$16 sps:$4 sm:$0xff]  }
  0x86   :  { %1876 = vmatprep.mubr.bf16.mxu1 %v3313_v3  ;;  %v2879_v3 = vld [vmem:[%s4072_s1 + $0x88] ss:$16 sps:$4 sm:$0xff]   ;;  %v2956_v32 = vld [vmem:[%s4072_s1 + $0x30c] ss:$16 sps:$4 sm:$0xff]  }
  0x87   :  { %1806 = vmatpush1.bf16.msra.mxu0 %v2867_v34  ;;  %v2954_v34 = vld [vmem:[%s4072_s1 + $0x308] ss:$16 sps:$4 sm:$0xff]  }
  0x88   :  { %1847 = vmatpush1.bf16.msra.mxu1 %v2870_v35  ;;  %1807 = vmatprep.subr.bf16.mxu0 %v2875_v36  ;;  %v2959_v35 = vld [vmem:[%s4072_s1 + $0x4ec] ss:$16 sps:$4 sm:$0xff]  }
  0x89   :  { %1848 = vmatprep.subr.bf16.mxu1 %v2878_v37  ;;  %v2962_v36 = vld [vmem:[%s4072_s1 + $0x6ec] ss:$16 sps:$4 sm:$0xff]   ;;  %v2957_v37 = vld [vmem:[%s4072_s1 + $0x4e8] ss:$16 sps:$4 sm:$0xff]  }
  0x8b   :  { %1808 = vmatpush1.bf16.msra.mxu0 %v2873_v38  ;;  %v2960_v38 = vld [vmem:[%s4072_s1 + $0x6e8] ss:$16 sps:$4 sm:$0xff]  }
  0x8c   :  { %1849 = vmatpush1.bf16.msra.mxu1 %v2876_v39  ;;  %1809 = vmatprep.subr.bf16.mxu0 %v2881_v40  ;;  %v2965_v39 = vld [vmem:[%s4072_s1 + $0x4cc] ss:$16 sps:$4 sm:$0xff]  }
  0x8d   :  { %1850 = vmatprep.subr.bf16.mxu1 %v2884_v62  ;;  %v2968_v40 = vld [vmem:[%s4072_s1 + $0x6cc] ss:$16 sps:$4 sm:$0xff]   ;;  %v2963_v62 = vld [vmem:[%s4072_s1 + $0x4c8] ss:$16 sps:$4 sm:$0xff]  }
  0x8f   :  { %1810 = vmatpush1.bf16.msra.mxu0 %v2879_v3  ;;  %v2966_v3 = vld [vmem:[%s4072_s1 + $0x6c8] ss:$16 sps:$4 sm:$0xff]  }
  0x90   :  { %1851 = vmatpush1.bf16.msra.mxu1 %v2882_v41  ;;  %1811 = vmatprep.subr.bf16.mxu0 %v2887_v43 }
  0x91   :  { %1852 = vmatprep.subr.bf16.mxu1 %v2890_v44 }
  0x93   :  { %1812 = vmatpush1.bf16.msra.mxu0 %v2885_v45 }
  0x94   :  { %1853 = vmatpush1.bf16.msra.mxu1 %v2888_v46  ;;  %1813 = vmatprep.subr.bf16.mxu0 %v2893_v47 }
  0x95   :  { %1854 = vmatprep.subr.bf16.mxu1 %v2896_v48 }
  0x97   :  { %1814 = vmatpush1.bf16.msra.mxu0 %v2891_v49 }
  0x98   :  { %1855 = vmatpush1.bf16.msra.mxu1 %v2894_v50  ;;  %1815 = vmatprep.subr.bf16.mxu0 %v2899_v51 }
  0x99   :  { %1856 = vmatprep.subr.bf16.mxu1 %v2902_v52 }
  0x9b   :  { %1816 = vmatpush1.bf16.msra.mxu0 %v2897_v53 }
  0x9c   :  { %1857 = vmatpush1.bf16.msra.mxu1 %v2900_v54  ;;  %1817 = vmatprep.subr.bf16.mxu0 %v2905_v55 }
  0x9d   :  { %1858 = vmatprep.subr.bf16.mxu1 %v2908_v56 }
  0x9f   :  { %1818 = vmatpush1.bf16.msra.mxu0 %v2903_v57 }
  0xa0   :  { %1859 = vmatpush1.bf16.msra.mxu1 %v2906_v58  ;;  %1819 = vmatprep.subr.bf16.mxu0 %v2911_v59 }
  0xa1   :  { %1860 = vmatprep.subr.bf16.mxu1 %v2914_v60 }
  0xa3   :  { %1820 = vmatpush2.bf16.msra.mxu0 %v2909_v61 }
  0xa4   :  { %1861 = vmatpush2.bf16.msra.mxu1 %v2912_v0  ;;  %1821 = vmatprep.subr.bf16.mxu0 %v2917_v1 }
  0xa5   :  { %1862 = vmatprep.subr.bf16.mxu1 %v2920_v2 }
  0xa7   :  { %1822 = vmatpush2.bf16.msra.mxu0 %v2915_v4 }
  0xa8   :  { %1863 = vmatpush2.bf16.msra.mxu1 %v2918_v5  ;;  %1823 = vmatprep.subr.bf16.mxu0 %v2923_v6 }
  0xa9   :  { %1864 = vmatprep.subr.bf16.mxu1 %v2926_v7 }
  0xab   :  { %1824 = vmatpush2.bf16.msra.mxu0 %v2921_v8 }
  0xac   :  { %1865 = vmatpush2.bf16.msra.mxu1 %v2924_v9  ;;  %1825 = vmatprep.subr.bf16.mxu0 %v2929_v10 }
  0xad   :  { %1866 = vmatprep.subr.bf16.mxu1 %v2932_v11 }
  0xaf   :  { %1826 = vmatpush2.bf16.msra.mxu0 %v2927_v12 }
  0xb0   :  { %1867 = vmatpush2.bf16.msra.mxu1 %v2930_v13  ;;  %1827 = vmatprep.subr.bf16.mxu0 %v2935_v15 }
  0xb1   :  { %1868 = vmatprep.subr.bf16.mxu1 %v2938_v16 }
  0xb3   :  { %1828 = vmatpush2.bf16.msra.mxu0 %v2933_v17 }
  0xb4   :  { %1869 = vmatpush2.bf16.msra.mxu1 %v2936_v20  ;;  %1829 = vmatprep.subr.bf16.mxu0 %v2941_v21 }
  0xb5   :  { %1870 = vmatprep.subr.bf16.mxu1 %v2944_v22 }
  0xb7   :  { %1830 = vmatpush2.bf16.msra.mxu0 %v2939_v23 }
  0xb8   :  { %1871 = vmatpush2.bf16.msra.mxu1 %v2942_v25  ;;  %1831 = vmatprep.subr.bf16.mxu0 %v2947_v26 }
  0xb9   :  { %1872 = vmatprep.subr.bf16.mxu1 %v2950_v27 }
  0xbb   :  { %1832 = vmatpush2.bf16.msra.mxu0 %v2945_v28 }
  0xbc   :  { %1873 = vmatpush2.bf16.msra.mxu1 %v2948_v30  ;;  %1833 = vmatprep.subr.bf16.mxu0 %v2953_v31 }
  0xbd   :  { %1874 = vmatprep.subr.bf16.mxu1 %v2956_v32 }
  0xbf   :  { %1834 = vmatpush2.bf16.msra.mxu0 %v2951_v33 }
  0xc0   :  { %1875 = vmatpush2.bf16.msra.mxu1 %v2954_v34  ;;  %1885 = vmatprep.subr.bf16.mxu0 %v2959_v35 }
  0xc1   :  { %1926 = vmatprep.subr.bf16.mxu1 %v2962_v36 }
  0xc2   :  { %1836 = vmatmul.mubr.bf16.vlgmr.msra.gmra.mxu0 %v3344_v14 }
  0xc3   :  { %1877 = vmatmul.mubr.bf16.vlgmr.msra.gmra.mxu1 %v3359_v19  ;;  %1886 = vmatpush1.bf16.msra.mxu0 %v2957_v37 }
  0xc4   :  { %1927 = vmatpush1.bf16.msra.mxu1 %v2960_v38 }
  0xc5   :  { %10 = vsyncpa [#allocation3], 0  ;;  %1887 = vmatprep.subr.bf16.mxu0 %v2965_v39  ;;  %1928 = vmatprep.subr.bf16.mxu1 %v2968_v40  ;;  %v2971_v41 = vld [vmem:[%s4072_s1 + $0x4ac] ss:$16 sps:$4 sm:$0xff]   ;;  %v2969_v14 = vld [vmem:[%s4072_s1 + $0x4a8] ss:$16 sps:$4 sm:$0xff]  }
  0xc6   :  { %v2974_v43 = vld [vmem:[%s4072_s1 + $0x6ac] ss:$16 sps:$4 sm:$0xff]   ;;  %1917 = vmatprep.mubr.bf16.mxu0 %v3355_v18  ;;  %1958 = vmatprep.mubr.bf16.mxu1 %v3375_v24  ;;  %v2972_v19 = vld [vmem:[%s4072_s1 + $0x6a8] ss:$16 sps:$4 sm:$0xff]   ;;  %v3055_v40 = vld [vmem:[%s4074_s3 + $0x70] sm:$0xff]   ;;  %s3108_s26 = smov [#allocation2]  }
  0xc7   :  { %1888 = vmatpush1.bf16.msra.mxu0 %v2963_v62  ;;  %v2977_v44 = vld [vmem:[%s4072_s1 + $0x48c] ss:$16 sps:$4 sm:$0xff]   ;;  %v2975_v24 = vld [vmem:[%s4072_s1 + $0x488] ss:$16 sps:$4 sm:$0xff]   ;;  %s2325_s27 = sshll.u32 %s3108_s26, 4  ;;  %s2326_s27 = int_to_ptr.vmem [resolvable:$true] %s2325_s27 }
  0xc8   :  { %1929 = vmatpush1.bf16.msra.mxu1 %v2966_v3  ;;  %1889 = vmatprep.subr.bf16.mxu0 %v2971_v41  ;;  %v2980_v18 = vld [vmem:[%s4072_s1 + $0x68c] ss:$16 sps:$4 sm:$0xff]   ;;  %v2978_v45 = vld [vmem:[%s4072_s1 + $0x688] ss:$16 sps:$4 sm:$0xff]   ;;  %v3056_v41 = vld [vmem:[%s4074_s3 + $0x30] sm:$0xff]   ;;  %s3085_s28 = scalar_lea.vmem %s2326_s27, 32  ;;  %p3090_p1 = scmp.lt.s32.totalorder %s2326_s27, %s2326_s27 }
  0xc9   :  { %1930 = vmatprep.subr.bf16.mxu1 %v2974_v43  ;;  %v2983_v46 = vld [vmem:[%s4072_s1 + $0x46c] ss:$16 sps:$4 sm:$0xff]   ;;  %v2981_v48 = vld [vmem:[%s4072_s1 + $0x468] ss:$16 sps:$4 sm:$0xff]   ;;  %p3086_p0 = scmp.ne.s32.totalorder %s2326_s27, %s3085_s28  ;;  %p3091_p2 = scmp.lt.s32.totalorder %s3085_s28, %s3085_s28 }
  0xca   :  { %v2986_v47 = vld [vmem:[%s4072_s1 + $0x66c] ss:$16 sps:$4 sm:$0xff]   ;;  %v2984_v49 = vld [vmem:[%s4072_s1 + $0x668] ss:$16 sps:$4 sm:$0xff]  }
  0xcb   :  { %1890 = vmatpush1.bf16.msra.mxu0 %v2969_v14  ;;  %v2989_v50 = vld [vmem:[%s4072_s1 + $0x44c] ss:$16 sps:$4 sm:$0xff]   ;;  %v2987_v52 = vld [vmem:[%s4072_s1 + $0x448] ss:$16 sps:$4 sm:$0xff]   ;;  %p3092_p3 = por %p3091_p2, %p3090_p1 }
  0xcc   :  { %1931 = vmatpush1.bf16.msra.mxu1 %v2972_v19  ;;  %1891 = vmatprep.subr.bf16.mxu0 %v2977_v44  ;;  %v2992_v51 = vld [vmem:[%s4072_s1 + $0x64c] ss:$16 sps:$4 sm:$0xff]   ;;  %v2990_v53 = vld [vmem:[%s4072_s1 + $0x648] ss:$16 sps:$4 sm:$0xff]  }
  0xcd   :  { %1932 = vmatprep.subr.bf16.mxu1 %v2980_v18  ;;  %v2995_v54 = vld [vmem:[%s4072_s1 + $0x42c] ss:$16 sps:$4 sm:$0xff]   ;;  %v2993_v56 = vld [vmem:[%s4072_s1 + $0x428] ss:$16 sps:$4 sm:$0xff]   ;;  %p3093_p4 = pnand %p3092_p3, %p3086_p0 }
  0xce   :  { %v2998_v55 = vld [vmem:[%s4072_s1 + $0x62c] ss:$16 sps:$4 sm:$0xff]   ;;  %v2996_v57 = vld [vmem:[%s4072_s1 + $0x628] ss:$16 sps:$4 sm:$0xff]  }
  0xcf   :  { %1892 = vmatpush1.bf16.msra.mxu0 %v2975_v24  ;;  %v3001_v58 = vld [vmem:[%s4072_s1 + $0x40c] ss:$16 sps:$4 sm:$0xff]   ;;  %v2999_v60 = vld [vmem:[%s4072_s1 + $0x408] ss:$16 sps:$4 sm:$0xff]  }
  0xd0   :  { %1933 = vmatpush1.bf16.msra.mxu1 %v2978_v45  ;;  %1893 = vmatprep.subr.bf16.mxu0 %v2983_v46  ;;  %v3004_v59 = vld [vmem:[%s4072_s1 + $0x60c] ss:$16 sps:$4 sm:$0xff]   ;;  %v3002_v61 = vld [vmem:[%s4072_s1 + $0x608] ss:$16 sps:$4 sm:$0xff]  }
  0xd1   :  { %1934 = vmatprep.subr.bf16.mxu1 %v2986_v47  ;;  %v3007_v0 = vld [vmem:[%s4072_s1 + $0x5ec] ss:$16 sps:$4 sm:$0xff]   ;;  %v3005_v2 = vld [vmem:[%s4072_s1 + $0x5e8] ss:$16 sps:$4 sm:$0xff]  }
  0xd2   :  { %v3010_v1 = vld [vmem:[%s4072_s1 + $0x7ec] ss:$16 sps:$4 sm:$0xff]   ;;  %v3008_v4 = vld [vmem:[%s4072_s1 + $0x7e8] ss:$16 sps:$4 sm:$0xff]  }
  0xd3   :  { %1894 = vmatpush1.bf16.msra.mxu0 %v2981_v48  ;;  %v3013_v5 = vld [vmem:[%s4072_s1 + $0x5cc] ss:$16 sps:$4 sm:$0xff]   ;;  %v3011_v7 = vld [vmem:[%s4072_s1 + $0x5c8] ss:$16 sps:$4 sm:$0xff]   ;;  %v3071_v48 = vld [vmem:[%s4074_s3 + $0xf0] sm:$0xff]  }
  0xd4   :  { %1935 = vmatpush1.bf16.msra.mxu1 %v2984_v49  ;;  %1895 = vmatprep.subr.bf16.mxu0 %v2989_v50  ;;  %v3016_v6 = vld [vmem:[%s4072_s1 + $0x7cc] ss:$16 sps:$4 sm:$0xff]   ;;  %v3014_v8 = vld [vmem:[%s4072_s1 + $0x7c8] ss:$16 sps:$4 sm:$0xff]   ;;  %v3060_v49 = vld [vmem:[%s4074_s3 + $0x20] sm:$0xff]  }
  0xd5   :  { %1936 = vmatprep.subr.bf16.mxu1 %v2992_v51  ;;  %v3019_v9 = vld [vmem:[%s4072_s1 + $0x5ac] ss:$16 sps:$4 sm:$0xff]   ;;  %v3017_v11 = vld [vmem:[%s4072_s1 + $0x5a8] ss:$16 sps:$4 sm:$0xff]   ;;  %v3072_v50 = vld [vmem:[%s4074_s3 + $0xb0] sm:$0xff]  }
  0xd6   :  { %v3022_v10 = vld [vmem:[%s4072_s1 + $0x7ac] ss:$16 sps:$4 sm:$0xff]   ;;  %v3020_v12 = vld [vmem:[%s4072_s1 + $0x7a8] ss:$16 sps:$4 sm:$0xff]  }
  0xd7   :  { %1896 = vmatpush1.bf16.msra.mxu0 %v2987_v52  ;;  %v3025_v13 = vld [vmem:[%s4072_s1 + $0x58c] ss:$16 sps:$4 sm:$0xff]   ;;  %v3023_v16 = vld [vmem:[%s4072_s1 + $0x588] ss:$16 sps:$4 sm:$0xff]  }
  0xd8   :  { %1937 = vmatpush1.bf16.msra.mxu1 %v2990_v53  ;;  %1897 = vmatprep.subr.bf16.mxu0 %v2995_v54  ;;  %v3028_v15 = vld [vmem:[%s4072_s1 + $0x78c] ss:$16 sps:$4 sm:$0xff]   ;;  %v3026_v17 = vld [vmem:[%s4072_s1 + $0x788] ss:$16 sps:$4 sm:$0xff]  }
  0xd9   :  { %1938 = vmatprep.subr.bf16.mxu1 %v2998_v55  ;;  %v3031_v20 = vld [vmem:[%s4072_s1 + $0x56c] ss:$16 sps:$4 sm:$0xff]   ;;  %v3029_v22 = vld [vmem:[%s4072_s1 + $0x568] ss:$16 sps:$4 sm:$0xff]   ;;  %v3063_v55 = vld [vmem:[%s4074_s3 + $0x50] sm:$0xff]  }
  0xda   :  { %v3034_v21 = vld [vmem:[%s4072_s1 + $0x76c] ss:$16 sps:$4 sm:$0xff]   ;;  %v3032_v23 = vld [vmem:[%s4072_s1 + $0x768] ss:$16 sps:$4 sm:$0xff]  }
  0xdb   :  { %1898 = vmatpush1.bf16.msra.mxu0 %v2993_v56  ;;  %v3037_v25 = vld [vmem:[%s4072_s1 + $0x54c] ss:$16 sps:$4 sm:$0xff]   ;;  %v3035_v27 = vld [vmem:[%s4072_s1 + $0x548] ss:$16 sps:$4 sm:$0xff]   ;;  %v3075_v56 = vld [vmem:[%s4074_s3 + $0xe0] sm:$0xff]  }
  0xdc   :  { %1939 = vmatpush1.bf16.msra.mxu1 %v2996_v57  ;;  %1899 = vmatprep.subr.bf16.mxu0 %v3001_v58  ;;  %v3040_v26 = vld [vmem:[%s4072_s1 + $0x74c] ss:$16 sps:$4 sm:$0xff]   ;;  %v3038_v28 = vld [vmem:[%s4072_s1 + $0x748] ss:$16 sps:$4 sm:$0xff]   ;;  %v3064_v57 = vld [vmem:[%s4074_s3 + $0x10] sm:$0xff]  }
  0xdd   :  { %1940 = vmatprep.subr.bf16.mxu1 %v3004_v59  ;;  %v3043_v30 = vld [vmem:[%s4072_s1 + $0x52c] ss:$16 sps:$4 sm:$0xff]   ;;  %v3041_v32 = vld [vmem:[%s4072_s1 + $0x528] ss:$16 sps:$4 sm:$0xff]   ;;  %v3076_v58 = vld [vmem:[%s4074_s3 + $0xa0] sm:$0xff]  }
  0xde   :  { %v3046_v31 = vld [vmem:[%s4072_s1 + $0x72c] ss:$16 sps:$4 sm:$0xff]   ;;  %v3044_v33 = vld [vmem:[%s4072_s1 + $0x728] ss:$16 sps:$4 sm:$0xff]  }
  0xdf   :  { %1900 = vmatpush1.bf16.msra.mxu0 %v2999_v60  ;;  %v3049_v34 = vld [vmem:[%s4072_s1 + $0x50c] ss:$16 sps:$4 sm:$0xff]   ;;  %v3047_v36 = vld [vmem:[%s4072_s1 + $0x508] ss:$16 sps:$4 sm:$0xff]  }
  0xe0   :  { %1941 = vmatpush1.bf16.msra.mxu1 %v3002_v61  ;;  %1901 = vmatprep.subr.bf16.mxu0 %v3007_v0  ;;  %v3052_v35 = vld [vmem:[%s4072_s1 + $0x70c] ss:$16 sps:$4 sm:$0xff]   ;;  %v3050_v37 = vld [vmem:[%s4072_s1 + $0x708] ss:$16 sps:$4 sm:$0xff]  }
  0xe1   :  { %1942 = vmatprep.subr.bf16.mxu1 %v3010_v1  ;;  %v3053_v38 = vld [vmem:[%s4074_s3 + $0x78] sm:$0xff]   ;;  %v3057_v19 = vld [vmem:[%s4074_s3 + $0x68] sm:$0xff]   ;;  %v3067_v1 = vld [vmem:[%s4074_s3 + $0x40] sm:$0xff]  }
  0xe2   :  { %v3054_v39 = vld [vmem:[%s4074_s3 + $0x38] sm:$0xff]   ;;  %v3073_v52 = vld [vmem:[%s4074_s3 + $0xe8] sm:$0xff]  }
  0xe3   :  { %1902 = vmatpush2.bf16.msra.mxu0 %v3005_v2  ;;  %v3069_v46 = vld [vmem:[%s4074_s3 + $0xf8] sm:$0xff]   ;;  %v3074_v54 = vld [vmem:[%s4074_s3 + $0xa8] sm:$0xff]   ;;  %v3068_v2 = vld [vmem:[%s4074_s3] sm:$0xff]  }
  0xe4   :  { %1943 = vmatpush2.bf16.msra.mxu1 %v3008_v4  ;;  %1903 = vmatprep.subr.bf16.mxu0 %v3013_v5  ;;  %v3070_v47 = vld [vmem:[%s4074_s3 + $0xb8] sm:$0xff]   ;;  %v3065_v59 = vld [vmem:[%s4074_s3 + $0x48] sm:$0xff]   ;;  %v283_v4 = vsub.s32 0, %v3256_v42  ;;  %v279_v5 = vld [vmem:[%s4073_s2] sm:$0xf] }
  0xe5   :  { %1944 = vmatprep.subr.bf16.mxu1 %v3016_v6  ;;  %v3061_v51 = vld [vmem:[%s4074_s3 + $0x58] sm:$0xff]   ;;  %v3066_v61 = vld [vmem:[%s4074_s3 + $0x8] sm:$0xff]   ;;  %v287_v6 = vsub.s32 1, %v3256_v42 }
  0xe6   :  { %v3062_v53 = vld [vmem:[%s4074_s3 + $0x18] sm:$0xff]  }
  0xe7   :  { %1904 = vmatpush2.bf16.msra.mxu0 %v3011_v7  ;;  %v3077_v60 = vld [vmem:[%s4074_s3 + $0xd8] sm:$0xff]   ;;  %v284_v7 = vrot.slane %v279_v5, %v283_v4 }
  0xe8   :  { %1945 = vmatpush2.bf16.msra.mxu1 %v3014_v8  ;;  %1905 = vmatprep.subr.bf16.mxu0 %v3019_v9  ;;  %v3078_v0 = vld [vmem:[%s4074_s3 + $0x98] sm:$0xff]   ;;  %v288_v8 = vrot.slane %v279_v5, %v287_v6 }
  0xe9   :  { %1946 = vmatprep.subr.bf16.mxu1 %v3022_v10 }
  0xeb   :  { %1906 = vmatpush2.bf16.msra.mxu0 %v3017_v11  ;;  %v3079_v11 = vld [vmem:[%s4074_s3 + $0xd0] sm:$0xff]  }
  0xec   :  { %1947 = vmatpush2.bf16.msra.mxu1 %v3020_v12  ;;  %1907 = vmatprep.subr.bf16.mxu0 %v3025_v13  ;;  %v3080_v13 = vld [vmem:[%s4074_s3 + $0x90] sm:$0xff]  }
  0xed   :  { %1948 = vmatprep.subr.bf16.mxu1 %v3028_v15 }
  0xef   :  { %1908 = vmatpush2.bf16.msra.mxu0 %v3023_v16 }
  0xf0   :  { %1949 = vmatpush2.bf16.msra.mxu1 %v3026_v17  ;;  %1909 = vmatprep.subr.bf16.mxu0 %v3031_v20 }
  0xf1   :  { %1950 = vmatprep.subr.bf16.mxu1 %v3034_v21 }
  0xf3   :  { %1910 = vmatpush2.bf16.msra.mxu0 %v3029_v22 }
  0xf4   :  { %1951 = vmatpush2.bf16.msra.mxu1 %v3032_v23  ;;  %1911 = vmatprep.subr.bf16.mxu0 %v3037_v25  ;;  %v3081_v23 = vld [vmem:[%s4074_s3 + $0xc8] sm:$0xff]  }
  0xf5   :  { %1952 = vmatprep.subr.bf16.mxu1 %v3040_v26 }
  0xf7   :  { %1912 = vmatpush2.bf16.msra.mxu0 %v3035_v27  ;;  %v3082_v27 = vld [vmem:[%s4074_s3 + $0x88] sm:$0xff]  }
  0xf8   :  { %1953 = vmatpush2.bf16.msra.mxu1 %v3038_v28  ;;  %1913 = vmatprep.subr.bf16.mxu0 %v3043_v30 }
  0xf9   :  { %1954 = vmatprep.subr.bf16.mxu1 %v3046_v31 }
  0xfb   :  { %1914 = vmatpush2.bf16.msra.mxu0 %v3041_v32 }
  0xfc   :  { %1955 = vmatpush2.bf16.msra.mxu1 %v3044_v33  ;;  %1915 = vmatprep.subr.bf16.mxu0 %v3049_v34 }
  0xfd   :  { %1956 = vmatprep.subr.bf16.mxu1 %v3052_v35  ;;  %v3083_v35 = vld [vmem:[%s4074_s3 + $0xc0] sm:$0xff]  }
  0xff   :  { %1916 = vmatpush2.bf16.msra.mxu0 %v3047_v36 }
 0x100   :  { %1957 = vmatpush2.bf16.msra.mxu1 %v3050_v37  ;;  %2622 = vmatprep.subr.bf16.mxu0 %v3053_v38  ;;  %v3084_v37 = vld [vmem:[%s4074_s3 + $0x80] sm:$0xff]  }
 0x101   :  { %2644 = vmatprep.subr.bf16.mxu1 %v3069_v46 }
 0x102   :  { %v3960_v62 = vpop.f32.mrf.mxu0  ;;  %1918 = vmatmul.mubr.bf16.vlgmr.msra.gmra.mxu0 %v3300_v63  ;;  %v3058_v63 = vld [vmem:[%s4074_s3 + $0x28] sm:$0xff]  }
 0x103   :  { %v3962_v3 = vpop.f32.mrf.mxu1  ;;  %1959 = vmatmul.mubr.bf16.vlgmr.msra.gmra.mxu1 %v3563_v29  ;;  %2623 = vmatpush3.bf16.msra.mxu0 %v3054_v39  ;;  %v3059_v29 = vld [vmem:[%s4074_s3 + $0x60] sm:$0xff]   ;;  %v1674_v9 = vadd.f32 %v3960_v62, %v284_v7 }
 0x104   :  { %v1675_v43 = vpop.f32.mrf.mxu0  ;;  %2624 = vmatprep.subr.bf16.mxu0 %v3055_v40  ;;  %2645 = vmatpush3.bf16.msra.mxu1 %v3070_v47 }
 0x105   :  { %v3969_v14 = vpop.f32.mrf.mxu1  ;;  %2646 = vmatprep.subr.bf16.mxu1 %v3071_v48  ;;  %v1676_v10 = vadd.f32 %v1675_v43, %v288_v8  ;;  %v1715_v12 = vadd.f32 %v3962_v3, %v1674_v9  ;;  %v2589_v8 = vld [vmem:[%s4075_s4] ss:$0 sm:$0xff] }
 0x106   :  { %v1677_v44 = vpop.f32.mrf.mxu0 }
 0x107   :  { %v1718_v18 = vpop.f32.mrf.mxu1  ;;  %2625 = vmatpush3.bf16.msra.mxu0 %v3056_v41  ;;  %v1717_v17 = vadd.f32 %v3969_v14, %v1676_v10 }
 0x108   :  { %v1678_v24 = vpop.f32.mrf.mxu0  ;;  %2626 = vmatprep.subr.bf16.mxu0 %v3057_v19  ;;  %2647 = vmatpush3.bf16.msra.mxu1 %v3072_v50  ;;  %v291_v18 = vsub.s32 2, %v3256_v42 }
 0x109   :  { %v1719_v45 = vpop.f32.mrf.mxu1  ;;  %2648 = vmatprep.subr.bf16.mxu1 %v3073_v52 }
 0x10b   :  { %2627 = vmatpush3.bf16.msra.mxu0 %v3058_v63  ;;  %v295_v63 = vsub.s32 3, %v3256_v42 }
 0x10c   :  { %2628 = vmatprep.subr.bf16.mxu0 %v3059_v29  ;;  %2649 = vmatpush3.bf16.msra.mxu1 %v3074_v54  ;;  %v292_v29 = vrot.slane %v279_v5, %v291_v18 }
 0x10d   :  { %2650 = vmatprep.subr.bf16.mxu1 %v3075_v56  ;;  %v296_v24 = vrot.slane %v279_v5, %v295_v63 }
 0x10f   :  { %2629 = vmatpush3.bf16.msra.mxu0 %v3060_v49 }
 0x110   :  { %2630 = vmatprep.subr.bf16.mxu0 %v3061_v51  ;;  %2651 = vmatpush3.bf16.msra.mxu1 %v3076_v58 }
 0x111   :  { %2652 = vmatprep.subr.bf16.mxu1 %v3077_v60 }
 0x113   :  { %2631 = vmatpush3.bf16.msra.mxu0 %v3062_v53 }
 0x114   :  { %2632 = vmatprep.subr.bf16.mxu0 %v3063_v55  ;;  %2653 = vmatpush3.bf16.msra.mxu1 %v3078_v0 }
 0x115   :  { %2654 = vmatprep.subr.bf16.mxu1 %v3079_v11 }
 0x117   :  { %2633 = vmatpush3.bf16.msra.mxu0 %v3064_v57 }
 0x118   :  { %2634 = vmatprep.subr.bf16.mxu0 %v3065_v59  ;;  %2655 = vmatpush3.bf16.msra.mxu1 %v3080_v13 }
 0x119   :  { %2656 = vmatprep.subr.bf16.mxu1 %v3081_v23 }
 0x11b   :  { %2635 = vmatpush3.bf16.msra.mxu0 %v3066_v61 }
 0x11c   :  { %2636 = vmatprep.subr.bf16.mxu0 %v3067_v1  ;;  %2657 = vmatpush3.bf16.msra.mxu1 %v3082_v27 }
 0x11d   :  { %2658 = vmatprep.subr.bf16.mxu1 %v3083_v35 }
 0x11f   :  { %2637 = vmatpush3.bf16.msra.mxu0 %v3068_v2 }
 0x120   :  { %2659 = vmatpush3.bf16.msra.mxu1 %v3084_v37 }
 0x142   :  { %v1755_v15 = vpop.f32.mrf.mxu0 }
 0x143   :  { %v1796_v16 = vpop.f32.mrf.mxu1  ;;  %v1756_v20 = vadd.f32 %v1755_v15, %v1715_v12 }
 0x144   :  { %v1757_v21 = vpop.f32.mrf.mxu0 }
 0x145   :  { %v1798_v22 = vpop.f32.mrf.mxu1  ;;  %v1797_v25 = vadd.f32 %v1796_v16, %v1756_v20  ;;  %v1758_v26 = vadd.f32 %v1757_v21, %v1717_v17 }
 0x146   :  { %v1759_v28 = vpop.f32.mrf.mxu0 }
 0x147   :  { %v1800_v30 = vpop.f32.mrf.mxu1  ;;  %v1799_v31 = vadd.f32 %v1798_v22, %v1758_v26  ;;  %v1967_v32 = vmax.f32 %v1797_v25, 0.0 }
 0x148   :  { %v1760_v33 = vpop.f32.mrf.mxu0 }
 0x149   :  { %v1801_v34 = vpop.f32.mrf.mxu1  ;;  %v1968_v36 = vmax.f32 %v1799_v31, 0.0  ;;  %v1971_v39 = vpack.c.bf16 %v1967_v32, %v1967_v32 }
 0x14b   :  { %v1972_v38 = vpack.c.bf16 %v1968_v36, %v1968_v36 }
 0x14d   :  { %2270 = vmatprep.mubr.bf16.mxu0 %v1972_v38 }
 0x14e   :  { %2271 = vmatmul.mubr.bf16.vlgmr.msra.gmra.mxu0 %v1971_v39 }
 0x182   :  { %v1837_v40 = vpop.f32.mrf.mxu0 }
 0x183   :  { %v1878_v62 = vpop.f32.mrf.mxu1  ;;  %v1838_v45 = vadd.f32 %v1837_v40, %v292_v29 }
 0x184   :  { %v1839_v3 = vpop.f32.mrf.mxu0 }
 0x185   :  { %v1880_v41 = vpop.f32.mrf.mxu1  ;;  %v1840_v46 = vadd.f32 %v1839_v3, %v296_v24  ;;  %v1879_v47 = vadd.f32 %v1878_v62, %v1838_v45 }
 0x186   :  { %v1841_v43 = vpop.f32.mrf.mxu0 }
 0x187   :  { %v1882_v14 = vpop.f32.mrf.mxu1  ;;  %v1881_v50 = vadd.f32 %v1880_v41, %v1840_v46 }
 0x188   :  { %v1842_v19 = vpop.f32.mrf.mxu0 }
 0x189   :  { %v1883_v44 = vpop.f32.mrf.mxu1 }
 0x1c2   :  { %v1919_v48 = vpop.f32.mrf.mxu0 }
 0x1c3   :  { %v1960_v49 = vpop.f32.mrf.mxu1  ;;  %v1920_v51 = vadd.f32 %v1919_v48, %v1879_v47 }
 0x1c4   :  { %v1921_v52 = vpop.f32.mrf.mxu0 }
 0x1c5   :  { %v1962_v53 = vpop.f32.mrf.mxu1  ;;  %v1961_v54 = vadd.f32 %v1960_v49, %v1920_v51  ;;  %v1922_v55 = vadd.f32 %v1921_v52, %v1881_v50 }
 0x1c6   :  { %v1923_v56 = vpop.f32.mrf.mxu0 }
 0x1c7   :  { %v1964_v57 = vpop.f32.mrf.mxu1  ;;  %v1963_v58 = vadd.f32 %v1962_v53, %v1922_v55  ;;  %v1969_v59 = vmax.f32 %v1961_v54, 0.0 }
 0x1c8   :  { %v1924_v60 = vpop.f32.mrf.mxu0 }
 0x1c9   :  { %v1965_v61 = vpop.f32.mrf.mxu1  ;;  %v1970_v42 = vmax.f32 %v1963_v58, 0.0  ;;  %v1973_v1 = vpack.c.bf16 %v1969_v59, %v1969_v59 }
 0x1cb   :  { %v1974_v0 = vpack.c.bf16 %v1970_v42, %v1970_v42 }
 0x1cd   :  { %2310 = vmatprep.mubr.bf16.mxu1 %v1974_v0 }
 0x1ce   :  { %2311 = vmatmul.mubr.bf16.vlgmr.msra.gmra.mxu1 %v1973_v1 }
 0x20e   :  { %v2638_v2 = vpop.f32.mrf.mxu0 }
 0x210   :  { %v2639_v4 = vpop.f32.mrf.mxu0 }
 0x211   :  { %v2640_v5 = vadd.f32 %v2639_v4, %v2638_v2 }
 0x212   :  { %v2641_v6 = vpop.f32.mrf.mxu0 }
 0x213   :  { %v2273_v11 = vadd.f32 %v2640_v5, %v2589_v8 }
 0x214   :  { %v2642_v7 = vpop.f32.mrf.mxu0 }
 0x28e   :  { %v2660_v9 = vpop.f32.mrf.mxu1 }
 0x290   :  { %v2661_v10 = vpop.f32.mrf.mxu1 }
 0x291   :  { %v2662_v12 = vadd.f32 %v2661_v10, %v2660_v9 }
 0x292   :  { %v2663_v13 = vpop.f32.mrf.mxu1 }
 0x293   :  { %v2313_v15 = vadd.f32 %v2662_v12, %v2273_v11 }
 0x294   :  { %v2664_v16 = vpop.f32.mrf.mxu1 }
 0x295   :  { %2318 = vst [vmem:[#allocation2] sm:$0x3] %v2313_v15 }
 0x296   :  { %3096 = shalt.err (!%p3093_p4)
}
 0x297   :  { %2328 = dma.vmem_to_hbm [thread:$0]  %s2326_s27, 32, %s4076_s5, [#allocation3]  }
 0x298   :  { %3105 = dma.done.wait [#allocation3], 32  }
 0x299   :  { %3106 = vsyncadd [#allocation3], 4294967264 }
 0x29a   :  { %2332 = vsyncpa [#allocation3], 1 }

</bundles_post_ra>
